<compile_context>
chip_gen: v6e
topology: v6e:2x2x1
jax: 0.10.0
libtpu: 0.0.40
codegen_flags: <defaults>
</compile_context>

<pallas_src>
import functools
import math

import jax
import jax.numpy as jnp
from jax.experimental import pallas as pl
from jax.experimental.pallas import tpu as pltpu


# ------------------------------ Fused kernel ------------------------------- #

def encoder_kernel(x_ref, pe_ref,
                   a1_ref, b1_ref, wqkv_ref, bqkv_ref,
                   a2_ref, b2_ref, w1_ref, bb1_ref, w2_ref, bb2_ref,
                   o_ref, *, num_layers, h, d_head, eps):
    B, N, D = x_ref.shape
    scale = 1.0 / math.sqrt(d_head)

    # --- PosEnc: X + dropout(X + PE)  ->  eval mode: 2*X + PE ---
    # TODO(synk): dropout (p=0.1) implemented as identity (eval mode).
    x = x_ref[...].astype(jnp.float32) * 2.0 + pe_ref[...].astype(jnp.float32)[None]

    for l in range(num_layers):                      # static unroll over layers
        a1 = a1_ref[l].astype(jnp.float32)           # (N, D)
        b1 = b1_ref[l].astype(jnp.float32)
        a2 = a2_ref[l].astype(jnp.float32)
        b2 = b2_ref[l].astype(jnp.float32)
        wqkv = wqkv_ref[l]                           # (D, 3D)
        bqkv = bqkv_ref[l]                           # (1, 3D)
        w1 = w1_ref[l]                               # (D, dff)
        bb1 = bb1_ref[l]                             # (1, dff)
        w2 = w2_ref[l]                               # (dff, D)
        bb2 = bb2_ref[l]                             # (1, D)

        # --- LayerNorm #1 (over sequence axis N, unbiased=False variance) ---
        mean1 = jnp.mean(x, axis=1, keepdims=True)
        xc1 = x - mean1                              # centered once, reused
        var1 = jnp.mean(xc1 * xc1, axis=1, keepdims=True)
        xn = xc1 * jax.lax.rsqrt(var1 + eps) * a1[None] + b1[None]

        # --- Fused QKV projection, batch rows merged into one MXU push ---
        qkv = (jnp.dot(xn.reshape(B * N, D), wqkv,
                       preferred_element_type=jnp.float32)
               + bqkv).reshape(B, N, 3 * D)
        q = qkv[:, :, 0 * D:1 * D] * scale           # scale folded into q
        k = qkv[:, :, 1 * D:2 * D]
        v = qkv[:, :, 2 * D:3 * D]

        # --- Multi-headed attention: batched per-head contractions, head
        #     outputs combined in registers (no VMEM scratch round-trip). ---
        heads = []
        for i in range(h):
            sl = slice(i * d_head, (i + 1) * d_head)
            qi, ki, vi = q[..., sl], k[..., sl], v[..., sl]
            s = jnp.einsum('bnd,bmd->bnm', qi, ki,
                           preferred_element_type=jnp.float32)      # (B, N, N)
            s = s - jnp.max(s, axis=-1, keepdims=True)
            e = jnp.exp(s)
            inv = pl.reciprocal(jnp.sum(e, axis=-1, keepdims=True), approx=True)
            heads.append(jnp.einsum('bnm,bmd->bnd', e * inv, vi,
                                    preferred_element_type=jnp.float32))
        attn = jnp.concatenate(heads, axis=-1)       # (B, N, D)

        # TODO(synk): ResidualConnection dropout (p=0.1) is identity (eval mode).
        y = x + attn

        # --- LayerNorm #2 (over sequence axis N) ---
        mean2 = jnp.mean(y, axis=1, keepdims=True)
        yc = y - mean2
        var2 = jnp.mean(yc * yc, axis=1, keepdims=True)
        yn = yc * jax.lax.rsqrt(var2 + eps) * a2[None] + b2[None]

        # --- FFN: W2(relu(W1(x))), batch rows merged ---
        hdn = jnp.maximum(
            jnp.dot(yn.reshape(B * N, D), w1,
                    preferred_element_type=jnp.float32) + bb1, 0.0)
        ffn = (jnp.dot(hdn, w2, preferred_element_type=jnp.float32)
               + bb2).reshape(B, N, D)

        x = y + ffn

    o_ref[...] = x.astype(o_ref.dtype)


# --------------------------------- Wrapper --------------------------------- #

def pack_params(layer_params):
    """Stack per-layer params along a leading layer axis; fuse Wq/Wk/Wv."""
    def stack(key):
        return jnp.stack([p[key] for p in layer_params])
    wqkv = jnp.stack([jnp.concatenate([p["Wq"], p["Wk"], p["Wv"]], axis=1)
                      for p in layer_params])
    bqkv = jnp.stack([jnp.concatenate([p["bq"], p["bk"], p["bv"]], axis=1)
                      for p in layer_params])
    return dict(alpha1=stack("alpha1"), beta1=stack("beta1"),
                Wqkv=wqkv, bqkv=bqkv,
                alpha2=stack("alpha2"), beta2=stack("beta2"),
                W1=stack("W1"), b1=stack("b1"),
                W2=stack("W2"), b2=stack("b2"))


def encoder_forward(x, pe, layer_params, *, h, eps=1e-5):
    """Full Encoder: positional encoding + all encoder layers, one kernel."""
    B, N, D = x.shape
    L = len(layer_params)
    packed = pack_params(layer_params)
    dff = packed["W1"].shape[-1]

    kernel = functools.partial(encoder_kernel, num_layers=L, h=h,
                               d_head=D // h, eps=eps)

    def fs(shape):
        return pl.BlockSpec(shape, lambda i: (0,) * len(shape))

    return pl.pallas_call(
        kernel,
        out_shape=jax.ShapeDtypeStruct((B, N, D), x.dtype),
        grid=(1,),
        in_specs=[
            fs((B, N, D)),                              # x
            fs((N, D)),                                 # positional encoding
            fs((L, N, D)), fs((L, N, D)),               # alpha1, beta1
            fs((L, D, 3 * D)), fs((L, 1, 3 * D)),       # Wqkv, bqkv
            fs((L, N, D)), fs((L, N, D)),               # alpha2, beta2
            fs((L, D, dff)), fs((L, 1, dff)),           # W1, b1
            fs((L, dff, D)), fs((L, 1, D)),             # W2, b2
        ],
        out_specs=fs((B, N, D)),
        compiler_params=pltpu.CompilerParams(
            dimension_semantics=("arbitrary",),
            vmem_limit_bytes=8 * 1024 * 1024),
    )(x, pe,
      packed["alpha1"], packed["beta1"], packed["Wqkv"], packed["bqkv"],
      packed["alpha2"], packed["beta2"],
      packed["W1"], packed["b1"], packed["W2"], packed["b2"])


# ---------------------------- Pure-JAX reference --------------------------- #

def encoder_layer_reference(x, params, *, h, eps=1e-5):
    def layer_norm(z, alpha, beta):
        mean = jnp.mean(z, axis=1, keepdims=True)
        var = jnp.mean((z - mean) ** 2, axis=1, keepdims=True)
        return (z - mean) / jnp.sqrt(var + eps) * alpha + beta

    B, N, D = x.shape
    d_head = D // h
    xn = layer_norm(x, params["alpha1"], params["beta1"])
    q = xn @ params["Wq"] + params["bq"]
    k = xn @ params["Wk"] + params["bk"]
    v = xn @ params["Wv"] + params["bv"]
    heads = []
    for i in range(h):
        sl = slice(i * d_head, (i + 1) * d_head)
        qi, ki, vi = q[..., sl], k[..., sl], v[..., sl]
        s = jnp.einsum("bnd,bmd->bnm", qi, ki) / math.sqrt(d_head)
        p = jax.nn.softmax(s, axis=-1)
        heads.append(jnp.einsum("bnm,bmd->bnd", p, vi))
    attn = jnp.concatenate(heads, axis=-1)
    y = x + attn
    yn = layer_norm(y, params["alpha2"], params["beta2"])
    ffn = jnp.maximum(yn @ params["W1"] + params["b1"], 0.0) @ params["W2"] + params["b2"]
    return y + ffn


def encoder_reference(x, pe, layer_params, *, h, eps=1e-5):
    x = x + (x + pe)            # PosEnc, dropout = identity
    for params in layer_params:
        x = encoder_layer_reference(x, params, h=h, eps=eps)
    return x


# ----------------------------------- main ---------------------------------- #

def make_layer_params(key, n, d, dff):
    ks = jax.random.split(key, 14)

    def uinit(k, shape, fan_in):
        lim = 1.0 / math.sqrt(fan_in)
        return jax.random.uniform(k, shape, jnp.float32, -lim, lim)

    return dict(
        alpha1=1.0 + 0.1 * jax.random.normal(ks[0], (n, d), jnp.float32),
        beta1=0.1 * jax.random.normal(ks[1], (n, d), jnp.float32),
        Wq=uinit(ks[2], (d, d), d), bq=uinit(ks[3], (1, d), d),
        Wk=uinit(ks[4], (d, d), d), bk=uinit(ks[5], (1, d), d),
        Wv=uinit(ks[6], (d, d), d), bv=uinit(ks[7], (1, d), d),
        alpha2=1.0 + 0.1 * jax.random.normal(ks[8], (n, d), jnp.float32),
        beta2=0.1 * jax.random.normal(ks[9], (n, d), jnp.float32),
        W1=uinit(ks[10], (d, dff), d), b1=uinit(ks[11], (1, dff), d),
        W2=uinit(ks[12], (dff, d), dff), b2=uinit(ks[13], (1, d), dff),
    )


def make_positional_encoding(n, d):
    pos = jnp.arange(n, dtype=jnp.float32)[:, None]                 # (n, 1)
    i = jnp.arange(d // 2, dtype=jnp.float32)[None, :]              # (1, d/2)
    denom = jnp.power(10000.0, 2.0 * i / d)
    pe = jnp.zeros((n, d), jnp.float32)
    pe = pe.at[:, 0::2].set(jnp.sin(pos / denom))
    pe = pe.at[:, 1::2].set(jnp.cos(pos / denom))
    return pe


if __name__ == "__main__":
    B, N, H, D = 2, 8, 4, 32
    DFF = 4 * D
    NUM_LAYERS = 2

    key = jax.random.PRNGKey(0)
    kx, *layer_keys = jax.random.split(key, NUM_LAYERS + 1)

    layer_params = [make_layer_params(k, N, D, DFF) for k in layer_keys]
    pe = make_positional_encoding(N, D)
    x = jax.random.normal(kx, (B, N, D), jnp.float32)

    out = jax.block_until_ready(encoder_forward(x, pe, layer_params, h=H))
    ref = encoder_reference(x, pe, layer_params, h=H)

    assert out.shape == (B, N, D)
    # Tolerance accounts for the EUP approx-reciprocal in the softmax denom.
    assert jnp.allclose(out, ref, atol=1e-3, rtol=1e-3), "mismatch vs reference"
    print("KERNEL_OK")
</pallas_src>

<mosaic_0001>
module attributes {stable_mosaic.version = 11 : i64} {
  func.func @encoder_kernel(%arg0: i32, %arg1: memref<2x8x32xf32, #tpu.memory_space<vmem>>, %arg2: memref<8x32xf32, #tpu.memory_space<vmem>>, %arg3: memref<2x8x32xf32, #tpu.memory_space<vmem>>, %arg4: memref<2x8x32xf32, #tpu.memory_space<vmem>>, %arg5: memref<2x32x96xf32, #tpu.memory_space<vmem>>, %arg6: memref<2x1x96xf32, #tpu.memory_space<vmem>>, %arg7: memref<2x8x32xf32, #tpu.memory_space<vmem>>, %arg8: memref<2x8x32xf32, #tpu.memory_space<vmem>>, %arg9: memref<2x32x128xf32, #tpu.memory_space<vmem>>, %arg10: memref<2x1x128xf32, #tpu.memory_space<vmem>>, %arg11: memref<2x128x32xf32, #tpu.memory_space<vmem>>, %arg12: memref<2x1x32xf32, #tpu.memory_space<vmem>>, %arg13: memref<2x8x32xf32, #tpu.memory_space<vmem>>) attributes {dimension_semantics = [#tpu.dimension_semantics<arbitrary>], iteration_bounds = array<i64: 1>, scalar_prefetch = 0 : i64, scratch_operands = 0 : i64, tpu.core_type = #tpu.core_type<tc>, window_params = [{pipeline_mode = #tpu.pipeline_mode<synchronous>, transform_indices = @transform_0, window_bounds = array<i64: 2, 8, 32>}, {pipeline_mode = #tpu.pipeline_mode<synchronous>, transform_indices = @transform_1, window_bounds = array<i64: 8, 32>}, {pipeline_mode = #tpu.pipeline_mode<synchronous>, transform_indices = @transform_2, window_bounds = array<i64: 2, 8, 32>}, {pipeline_mode = #tpu.pipeline_mode<synchronous>, transform_indices = @transform_3, window_bounds = array<i64: 2, 8, 32>}, {pipeline_mode = #tpu.pipeline_mode<synchronous>, transform_indices = @transform_4, window_bounds = array<i64: 2, 32, 96>}, {pipeline_mode = #tpu.pipeline_mode<synchronous>, transform_indices = @transform_5, window_bounds = array<i64: 2, 1, 96>}, {pipeline_mode = #tpu.pipeline_mode<synchronous>, transform_indices = @transform_6, window_bounds = array<i64: 2, 8, 32>}, {pipeline_mode = #tpu.pipeline_mode<synchronous>, transform_indices = @transform_7, window_bounds = array<i64: 2, 8, 32>}, {pipeline_mode = #tpu.pipeline_mode<synchronous>, transform_indices = @transform_8, window_bounds = array<i64: 2, 32, 128>}, {pipeline_mode = #tpu.pipeline_mode<synchronous>, transform_indices = @transform_9, window_bounds = array<i64: 2, 1, 128>}, {pipeline_mode = #tpu.pipeline_mode<synchronous>, transform_indices = @transform_10, window_bounds = array<i64: 2, 128, 32>}, {pipeline_mode = #tpu.pipeline_mode<synchronous>, transform_indices = @transform_11, window_bounds = array<i64: 2, 1, 32>}, {pipeline_mode = #tpu.pipeline_mode<synchronous>, transform_indices = @transform_12, window_bounds = array<i64: 2, 8, 32>}]} {
    %c0 = arith.constant 0 : index
    %c0_0 = arith.constant 0 : index
    %c0_1 = arith.constant 0 : index
    %0 = vector.load %arg1[%c0, %c0_0, %c0_1] : memref<2x8x32xf32, #tpu.memory_space<vmem>>, vector<2x8x32xf32>
    %cst = arith.constant 2.000000e+00 : f32
    %1 = vector.broadcast %cst : f32 to vector<2x8x32xf32>
    %2 = arith.mulf %0, %1 : vector<2x8x32xf32>
    %c0_2 = arith.constant 0 : index
    %c0_3 = arith.constant 0 : index
    %3 = vector.load %arg2[%c0_2, %c0_3] : memref<8x32xf32, #tpu.memory_space<vmem>>, vector<8x32xf32>
    %4 = vector.shape_cast %3 : vector<8x32xf32> to vector<1x8x32xf32>
    %5 = vector.broadcast %4 : vector<1x8x32xf32> to vector<2x8x32xf32>
    %6 = arith.addf %2, %5 : vector<2x8x32xf32>
    %c0_4 = arith.constant 0 : index
    %c0_5 = arith.constant 0 : index
    %c0_6 = arith.constant 0 : index
    %7 = vector.load %arg3[%c0_4, %c0_5, %c0_6] : memref<2x8x32xf32, #tpu.memory_space<vmem>>, vector<1x8x32xf32>
    %8 = vector.shape_cast %7 : vector<1x8x32xf32> to vector<8x32xf32>
    %c0_7 = arith.constant 0 : index
    %c0_8 = arith.constant 0 : index
    %c0_9 = arith.constant 0 : index
    %9 = vector.load %arg4[%c0_7, %c0_8, %c0_9] : memref<2x8x32xf32, #tpu.memory_space<vmem>>, vector<1x8x32xf32>
    %10 = vector.shape_cast %9 : vector<1x8x32xf32> to vector<8x32xf32>
    %c0_10 = arith.constant 0 : index
    %c0_11 = arith.constant 0 : index
    %c0_12 = arith.constant 0 : index
    %11 = vector.load %arg7[%c0_10, %c0_11, %c0_12] : memref<2x8x32xf32, #tpu.memory_space<vmem>>, vector<1x8x32xf32>
    %12 = vector.shape_cast %11 : vector<1x8x32xf32> to vector<8x32xf32>
    %c0_13 = arith.constant 0 : index
    %c0_14 = arith.constant 0 : index
    %c0_15 = arith.constant 0 : index
    %13 = vector.load %arg8[%c0_13, %c0_14, %c0_15] : memref<2x8x32xf32, #tpu.memory_space<vmem>>, vector<1x8x32xf32>
    %14 = vector.shape_cast %13 : vector<1x8x32xf32> to vector<8x32xf32>
    %c0_16 = arith.constant 0 : index
    %c0_17 = arith.constant 0 : index
    %c0_18 = arith.constant 0 : index
    %15 = vector.load %arg5[%c0_16, %c0_17, %c0_18] : memref<2x32x96xf32, #tpu.memory_space<vmem>>, vector<1x32x96xf32>
    %16 = vector.shape_cast %15 : vector<1x32x96xf32> to vector<32x96xf32>
    %c0_19 = arith.constant 0 : index
    %c0_20 = arith.constant 0 : index
    %c0_21 = arith.constant 0 : index
    %17 = vector.load %arg6[%c0_19, %c0_20, %c0_21] : memref<2x1x96xf32, #tpu.memory_space<vmem>>, vector<1x1x96xf32>
    %18 = vector.shape_cast %17 : vector<1x1x96xf32> to vector<1x96xf32>
    %c0_22 = arith.constant 0 : index
    %c0_23 = arith.constant 0 : index
    %c0_24 = arith.constant 0 : index
    %19 = vector.load %arg9[%c0_22, %c0_23, %c0_24] : memref<2x32x128xf32, #tpu.memory_space<vmem>>, vector<1x32x128xf32>
    %20 = vector.shape_cast %19 : vector<1x32x128xf32> to vector<32x128xf32>
    %c0_25 = arith.constant 0 : index
    %c0_26 = arith.constant 0 : index
    %c0_27 = arith.constant 0 : index
    %21 = vector.load %arg10[%c0_25, %c0_26, %c0_27] : memref<2x1x128xf32, #tpu.memory_space<vmem>>, vector<1x1x128xf32>
    %22 = vector.shape_cast %21 : vector<1x1x128xf32> to vector<1x128xf32>
    %c0_28 = arith.constant 0 : index
    %c0_29 = arith.constant 0 : index
    %c0_30 = arith.constant 0 : index
    %23 = vector.load %arg11[%c0_28, %c0_29, %c0_30] : memref<2x128x32xf32, #tpu.memory_space<vmem>>, vector<1x128x32xf32>
    %24 = vector.shape_cast %23 : vector<1x128x32xf32> to vector<128x32xf32>
    %c0_31 = arith.constant 0 : index
    %c0_32 = arith.constant 0 : index
    %c0_33 = arith.constant 0 : index
    %25 = vector.load %arg12[%c0_31, %c0_32, %c0_33] : memref<2x1x32xf32, #tpu.memory_space<vmem>>, vector<1x1x32xf32>
    %26 = vector.shape_cast %25 : vector<1x1x32xf32> to vector<1x32xf32>
    %cst_34 = arith.constant dense<0.000000e+00> : vector<2x32xf32>
    %27 = vector.multi_reduction <add>, %6, %cst_34 [1] : vector<2x8x32xf32> to vector<2x32xf32>
    %28 = vector.shape_cast %27 : vector<2x32xf32> to vector<2x1x32xf32>
    %cst_35 = arith.constant 8.000000e+00 : f32
    %29 = vector.broadcast %cst_35 : f32 to vector<2x1x32xf32>
    %30 = arith.divf %28, %29 : vector<2x1x32xf32>
    %31 = vector.broadcast %30 : vector<2x1x32xf32> to vector<2x8x32xf32>
    %32 = arith.subf %6, %31 : vector<2x8x32xf32>
    %33 = arith.mulf %32, %32 : vector<2x8x32xf32>
    %cst_36 = arith.constant dense<0.000000e+00> : vector<2x32xf32>
    %34 = vector.multi_reduction <add>, %33, %cst_36 [1] : vector<2x8x32xf32> to vector<2x32xf32>
    %35 = vector.shape_cast %34 : vector<2x32xf32> to vector<2x1x32xf32>
    %cst_37 = arith.constant 8.000000e+00 : f32
    %36 = vector.broadcast %cst_37 : f32 to vector<2x1x32xf32>
    %37 = arith.divf %35, %36 : vector<2x1x32xf32>
    %cst_38 = arith.constant 9.99999974E-6 : f32
    %38 = vector.broadcast %cst_38 : f32 to vector<2x1x32xf32>
    %39 = arith.addf %37, %38 : vector<2x1x32xf32>
    %40 = math.rsqrt %39 : vector<2x1x32xf32>
    %41 = vector.broadcast %40 : vector<2x1x32xf32> to vector<2x8x32xf32>
    %42 = arith.mulf %32, %41 : vector<2x8x32xf32>
    %43 = vector.shape_cast %8 : vector<8x32xf32> to vector<1x8x32xf32>
    %44 = vector.broadcast %43 : vector<1x8x32xf32> to vector<2x8x32xf32>
    %45 = arith.mulf %42, %44 : vector<2x8x32xf32>
    %46 = vector.shape_cast %10 : vector<8x32xf32> to vector<1x8x32xf32>
    %47 = vector.broadcast %46 : vector<1x8x32xf32> to vector<2x8x32xf32>
    %48 = arith.addf %45, %47 : vector<2x8x32xf32>
    %49 = vector.shape_cast %48 : vector<2x8x32xf32> to vector<16x32xf32>
    %cst_39 = arith.constant dense<0.000000e+00> : vector<16x96xf32>
    %50 = tpu.matmul %49, %16, %cst_39 {dimension_numbers = #tpu.dot_dimension_numbers<[1], [0], [0], [1], [0, 0, 1, 1], [], []>} : vector<16x32xf32>, vector<32x96xf32>, vector<16x96xf32> -> vector<16x96xf32>
    %51 = vector.broadcast %18 : vector<1x96xf32> to vector<16x96xf32>
    %52 = arith.addf %50, %51 : vector<16x96xf32>
    %53 = vector.shape_cast %52 : vector<16x96xf32> to vector<2x8x96xf32>
    %54 = vector.extract_strided_slice %53 {offsets = [0, 0, 0], sizes = [2, 8, 32], strides = [1, 1, 1]} : vector<2x8x96xf32> to vector<2x8x32xf32>
    %cst_40 = arith.constant 0.353553385 : f32
    %55 = vector.broadcast %cst_40 : f32 to vector<2x8x32xf32>
    %56 = arith.mulf %54, %55 : vector<2x8x32xf32>
    %57 = vector.extract_strided_slice %53 {offsets = [0, 0, 32], sizes = [2, 8, 32], strides = [1, 1, 1]} : vector<2x8x96xf32> to vector<2x8x32xf32>
    %58 = vector.extract_strided_slice %53 {offsets = [0, 0, 64], sizes = [2, 8, 32], strides = [1, 1, 1]} : vector<2x8x96xf32> to vector<2x8x32xf32>
    %59 = vector.extract_strided_slice %56 {offsets = [0, 0, 0], sizes = [2, 8, 8], strides = [1, 1, 1]} : vector<2x8x32xf32> to vector<2x8x8xf32>
    %60 = vector.extract_strided_slice %57 {offsets = [0, 0, 0], sizes = [2, 8, 8], strides = [1, 1, 1]} : vector<2x8x32xf32> to vector<2x8x8xf32>
    %61 = vector.extract_strided_slice %58 {offsets = [0, 0, 0], sizes = [2, 8, 8], strides = [1, 1, 1]} : vector<2x8x32xf32> to vector<2x8x8xf32>
    "tpu.trace_start"() <{level = 10 : i32, message = "bnd,bmd->bnm"}> : () -> ()
    %cst_41 = arith.constant dense<0.000000e+00> : vector<2x8x8xf32>
    %62 = tpu.matmul %59, %60, %cst_41 {dimension_numbers = #tpu.dot_dimension_numbers<[2], [2], [1], [1], [0, 0, 0, 1, 1, 1], [0], [0]>} : vector<2x8x8xf32>, vector<2x8x8xf32>, vector<2x8x8xf32> -> vector<2x8x8xf32>
    "tpu.trace_stop"() : () -> ()
    %cst_42 = arith.constant dense<0xFF800000> : vector<2x8xf32>
    %63 = vector.multi_reduction <maximumf>, %62, %cst_42 [2] : vector<2x8x8xf32> to vector<2x8xf32>
    %64 = vector.shape_cast %63 : vector<2x8xf32> to vector<2x8x1xf32>
    %65 = vector.broadcast %64 : vector<2x8x1xf32> to vector<2x8x8xf32>
    %66 = arith.subf %62, %65 : vector<2x8x8xf32>
    %67 = math.exp %66 : vector<2x8x8xf32>
    %cst_43 = arith.constant dense<0.000000e+00> : vector<2x8xf32>
    %68 = vector.multi_reduction <add>, %67, %cst_43 [2] : vector<2x8x8xf32> to vector<2x8xf32>
    %69 = vector.shape_cast %68 : vector<2x8xf32> to vector<2x8x1xf32>
    %70 = tpu.reciprocal %69 {approx = true} : vector<2x8x1xf32> -> vector<2x8x1xf32>
    %71 = vector.broadcast %70 : vector<2x8x1xf32> to vector<2x8x8xf32>
    %72 = arith.mulf %67, %71 : vector<2x8x8xf32>
    "tpu.trace_start"() <{level = 10 : i32, message = "bnm,bmd->bnd"}> : () -> ()
    %cst_44 = arith.constant dense<0.000000e+00> : vector<2x8x8xf32>
    %73 = tpu.matmul %72, %61, %cst_44 {dimension_numbers = #tpu.dot_dimension_numbers<[2], [1], [1], [2], [0, 0, 0, 1, 1, 2], [0], [0]>} : vector<2x8x8xf32>, vector<2x8x8xf32>, vector<2x8x8xf32> -> vector<2x8x8xf32>
    "tpu.trace_stop"() : () -> ()
    %74 = vector.extract_strided_slice %56 {offsets = [0, 0, 8], sizes = [2, 8, 8], strides = [1, 1, 1]} : vector<2x8x32xf32> to vector<2x8x8xf32>
    %75 = vector.extract_strided_slice %57 {offsets = [0, 0, 8], sizes = [2, 8, 8], strides = [1, 1, 1]} : vector<2x8x32xf32> to vector<2x8x8xf32>
    %76 = vector.extract_strided_slice %58 {offsets = [0, 0, 8], sizes = [2, 8, 8], strides = [1, 1, 1]} : vector<2x8x32xf32> to vector<2x8x8xf32>
    "tpu.trace_start"() <{level = 10 : i32, message = "bnd,bmd->bnm"}> : () -> ()
    %cst_45 = arith.constant dense<0.000000e+00> : vector<2x8x8xf32>
    %77 = tpu.matmul %74, %75, %cst_45 {dimension_numbers = #tpu.dot_dimension_numbers<[2], [2], [1], [1], [0, 0, 0, 1, 1, 1], [0], [0]>} : vector<2x8x8xf32>, vector<2x8x8xf32>, vector<2x8x8xf32> -> vector<2x8x8xf32>
    "tpu.trace_stop"() : () -> ()
    %cst_46 = arith.constant dense<0xFF800000> : vector<2x8xf32>
    %78 = vector.multi_reduction <maximumf>, %77, %cst_46 [2] : vector<2x8x8xf32> to vector<2x8xf32>
    %79 = vector.shape_cast %78 : vector<2x8xf32> to vector<2x8x1xf32>
    %80 = vector.broadcast %79 : vector<2x8x1xf32> to vector<2x8x8xf32>
    %81 = arith.subf %77, %80 : vector<2x8x8xf32>
    %82 = math.exp %81 : vector<2x8x8xf32>
    %cst_47 = arith.constant dense<0.000000e+00> : vector<2x8xf32>
    %83 = vector.multi_reduction <add>, %82, %cst_47 [2] : vector<2x8x8xf32> to vector<2x8xf32>
    %84 = vector.shape_cast %83 : vector<2x8xf32> to vector<2x8x1xf32>
    %85 = tpu.reciprocal %84 {approx = true} : vector<2x8x1xf32> -> vector<2x8x1xf32>
    %86 = vector.broadcast %85 : vector<2x8x1xf32> to vector<2x8x8xf32>
    %87 = arith.mulf %82, %86 : vector<2x8x8xf32>
    "tpu.trace_start"() <{level = 10 : i32, message = "bnm,bmd->bnd"}> : () -> ()
    %cst_48 = arith.constant dense<0.000000e+00> : vector<2x8x8xf32>
    %88 = tpu.matmul %87, %76, %cst_48 {dimension_numbers = #tpu.dot_dimension_numbers<[2], [1], [1], [2], [0, 0, 0, 1, 1, 2], [0], [0]>} : vector<2x8x8xf32>, vector<2x8x8xf32>, vector<2x8x8xf32> -> vector<2x8x8xf32>
    "tpu.trace_stop"() : () -> ()
    %89 = vector.extract_strided_slice %56 {offsets = [0, 0, 16], sizes = [2, 8, 8], strides = [1, 1, 1]} : vector<2x8x32xf32> to vector<2x8x8xf32>
    %90 = vector.extract_strided_slice %57 {offsets = [0, 0, 16], sizes = [2, 8, 8], strides = [1, 1, 1]} : vector<2x8x32xf32> to vector<2x8x8xf32>
    %91 = vector.extract_strided_slice %58 {offsets = [0, 0, 16], sizes = [2, 8, 8], strides = [1, 1, 1]} : vector<2x8x32xf32> to vector<2x8x8xf32>
    "tpu.trace_start"() <{level = 10 : i32, message = "bnd,bmd->bnm"}> : () -> ()
    %cst_49 = arith.constant dense<0.000000e+00> : vector<2x8x8xf32>
    %92 = tpu.matmul %89, %90, %cst_49 {dimension_numbers = #tpu.dot_dimension_numbers<[2], [2], [1], [1], [0, 0, 0, 1, 1, 1], [0], [0]>} : vector<2x8x8xf32>, vector<2x8x8xf32>, vector<2x8x8xf32> -> vector<2x8x8xf32>
    "tpu.trace_stop"() : () -> ()
    %cst_50 = arith.constant dense<0xFF800000> : vector<2x8xf32>
    %93 = vector.multi_reduction <maximumf>, %92, %cst_50 [2] : vector<2x8x8xf32> to vector<2x8xf32>
    %94 = vector.shape_cast %93 : vector<2x8xf32> to vector<2x8x1xf32>
    %95 = vector.broadcast %94 : vector<2x8x1xf32> to vector<2x8x8xf32>
    %96 = arith.subf %92, %95 : vector<2x8x8xf32>
    %97 = math.exp %96 : vector<2x8x8xf32>
    %cst_51 = arith.constant dense<0.000000e+00> : vector<2x8xf32>
    %98 = vector.multi_reduction <add>, %97, %cst_51 [2] : vector<2x8x8xf32> to vector<2x8xf32>
    %99 = vector.shape_cast %98 : vector<2x8xf32> to vector<2x8x1xf32>
    %100 = tpu.reciprocal %99 {approx = true} : vector<2x8x1xf32> -> vector<2x8x1xf32>
    %101 = vector.broadcast %100 : vector<2x8x1xf32> to vector<2x8x8xf32>
    %102 = arith.mulf %97, %101 : vector<2x8x8xf32>
    "tpu.trace_start"() <{level = 10 : i32, message = "bnm,bmd->bnd"}> : () -> ()
    %cst_52 = arith.constant dense<0.000000e+00> : vector<2x8x8xf32>
    %103 = tpu.matmul %102, %91, %cst_52 {dimension_numbers = #tpu.dot_dimension_numbers<[2], [1], [1], [2], [0, 0, 0, 1, 1, 2], [0], [0]>} : vector<2x8x8xf32>, vector<2x8x8xf32>, vector<2x8x8xf32> -> vector<2x8x8xf32>
    "tpu.trace_stop"() : () -> ()
    %104 = vector.extract_strided_slice %56 {offsets = [0, 0, 24], sizes = [2, 8, 8], strides = [1, 1, 1]} : vector<2x8x32xf32> to vector<2x8x8xf32>
    %105 = vector.extract_strided_slice %57 {offsets = [0, 0, 24], sizes = [2, 8, 8], strides = [1, 1, 1]} : vector<2x8x32xf32> to vector<2x8x8xf32>
    %106 = vector.extract_strided_slice %58 {offsets = [0, 0, 24], sizes = [2, 8, 8], strides = [1, 1, 1]} : vector<2x8x32xf32> to vector<2x8x8xf32>
    "tpu.trace_start"() <{level = 10 : i32, message = "bnd,bmd->bnm"}> : () -> ()
    %cst_53 = arith.constant dense<0.000000e+00> : vector<2x8x8xf32>
    %107 = tpu.matmul %104, %105, %cst_53 {dimension_numbers = #tpu.dot_dimension_numbers<[2], [2], [1], [1], [0, 0, 0, 1, 1, 1], [0], [0]>} : vector<2x8x8xf32>, vector<2x8x8xf32>, vector<2x8x8xf32> -> vector<2x8x8xf32>
    "tpu.trace_stop"() : () -> ()
    %cst_54 = arith.constant dense<0xFF800000> : vector<2x8xf32>
    %108 = vector.multi_reduction <maximumf>, %107, %cst_54 [2] : vector<2x8x8xf32> to vector<2x8xf32>
    %109 = vector.shape_cast %108 : vector<2x8xf32> to vector<2x8x1xf32>
    %110 = vector.broadcast %109 : vector<2x8x1xf32> to vector<2x8x8xf32>
    %111 = arith.subf %107, %110 : vector<2x8x8xf32>
    %112 = math.exp %111 : vector<2x8x8xf32>
    %cst_55 = arith.constant dense<0.000000e+00> : vector<2x8xf32>
    %113 = vector.multi_reduction <add>, %112, %cst_55 [2] : vector<2x8x8xf32> to vector<2x8xf32>
    %114 = vector.shape_cast %113 : vector<2x8xf32> to vector<2x8x1xf32>
    %115 = tpu.reciprocal %114 {approx = true} : vector<2x8x1xf32> -> vector<2x8x1xf32>
    %116 = vector.broadcast %115 : vector<2x8x1xf32> to vector<2x8x8xf32>
    %117 = arith.mulf %112, %116 : vector<2x8x8xf32>
    "tpu.trace_start"() <{level = 10 : i32, message = "bnm,bmd->bnd"}> : () -> ()
    %cst_56 = arith.constant dense<0.000000e+00> : vector<2x8x8xf32>
    %118 = tpu.matmul %117, %106, %cst_56 {dimension_numbers = #tpu.dot_dimension_numbers<[2], [1], [1], [2], [0, 0, 0, 1, 1, 2], [0], [0]>} : vector<2x8x8xf32>, vector<2x8x8xf32>, vector<2x8x8xf32> -> vector<2x8x8xf32>
    "tpu.trace_stop"() : () -> ()
    %119 = tpu.concatenate %73, %88, %103, %118 in 2 : vector<2x8x8xf32>, vector<2x8x8xf32>, vector<2x8x8xf32>, vector<2x8x8xf32> -> vector<2x8x32xf32>
    %120 = arith.addf %6, %119 : vector<2x8x32xf32>
    %cst_57 = arith.constant dense<0.000000e+00> : vector<2x32xf32>
    %121 = vector.multi_reduction <add>, %120, %cst_57 [1] : vector<2x8x32xf32> to vector<2x32xf32>
    %122 = vector.shape_cast %121 : vector<2x32xf32> to vector<2x1x32xf32>
    %cst_58 = arith.constant 8.000000e+00 : f32
    %123 = vector.broadcast %cst_58 : f32 to vector<2x1x32xf32>
    %124 = arith.divf %122, %123 : vector<2x1x32xf32>
    %125 = vector.broadcast %124 : vector<2x1x32xf32> to vector<2x8x32xf32>
    %126 = arith.subf %120, %125 : vector<2x8x32xf32>
    %127 = arith.mulf %126, %126 : vector<2x8x32xf32>
    %cst_59 = arith.constant dense<0.000000e+00> : vector<2x32xf32>
    %128 = vector.multi_reduction <add>, %127, %cst_59 [1] : vector<2x8x32xf32> to vector<2x32xf32>
    %129 = vector.shape_cast %128 : vector<2x32xf32> to vector<2x1x32xf32>
    %cst_60 = arith.constant 8.000000e+00 : f32
    %130 = vector.broadcast %cst_60 : f32 to vector<2x1x32xf32>
    %131 = arith.divf %129, %130 : vector<2x1x32xf32>
    %cst_61 = arith.constant 9.99999974E-6 : f32
    %132 = vector.broadcast %cst_61 : f32 to vector<2x1x32xf32>
    %133 = arith.addf %131, %132 : vector<2x1x32xf32>
    %134 = math.rsqrt %133 : vector<2x1x32xf32>
    %135 = vector.broadcast %134 : vector<2x1x32xf32> to vector<2x8x32xf32>
    %136 = arith.mulf %126, %135 : vector<2x8x32xf32>
    %137 = vector.shape_cast %12 : vector<8x32xf32> to vector<1x8x32xf32>
    %138 = vector.broadcast %137 : vector<1x8x32xf32> to vector<2x8x32xf32>
    %139 = arith.mulf %136, %138 : vector<2x8x32xf32>
    %140 = vector.shape_cast %14 : vector<8x32xf32> to vector<1x8x32xf32>
    %141 = vector.broadcast %140 : vector<1x8x32xf32> to vector<2x8x32xf32>
    %142 = arith.addf %139, %141 : vector<2x8x32xf32>
    %143 = vector.shape_cast %142 : vector<2x8x32xf32> to vector<16x32xf32>
    %cst_62 = arith.constant dense<0.000000e+00> : vector<16x128xf32>
    %144 = tpu.matmul %143, %20, %cst_62 {dimension_numbers = #tpu.dot_dimension_numbers<[1], [0], [0], [1], [0, 0, 1, 1], [], []>} : vector<16x32xf32>, vector<32x128xf32>, vector<16x128xf32> -> vector<16x128xf32>
    %145 = vector.broadcast %22 : vector<1x128xf32> to vector<16x128xf32>
    %146 = arith.addf %144, %145 : vector<16x128xf32>
    %cst_63 = arith.constant 0.000000e+00 : f32
    %147 = vector.broadcast %cst_63 : f32 to vector<16x128xf32>
    %148 = arith.maximumf %146, %147 : vector<16x128xf32>
    %cst_64 = arith.constant dense<0.000000e+00> : vector<16x32xf32>
    %149 = tpu.matmul %148, %24, %cst_64 {dimension_numbers = #tpu.dot_dimension_numbers<[1], [0], [0], [1], [0, 0, 1, 1], [], []>} : vector<16x128xf32>, vector<128x32xf32>, vector<16x32xf32> -> vector<16x32xf32>
    %150 = vector.broadcast %26 : vector<1x32xf32> to vector<16x32xf32>
    %151 = arith.addf %149, %150 : vector<16x32xf32>
    %152 = vector.shape_cast %151 : vector<16x32xf32> to vector<2x8x32xf32>
    %153 = arith.addf %120, %152 : vector<2x8x32xf32>
    %c1 = arith.constant 1 : index
    %c0_65 = arith.constant 0 : index
    %c0_66 = arith.constant 0 : index
    %154 = vector.load %arg3[%c1, %c0_65, %c0_66] : memref<2x8x32xf32, #tpu.memory_space<vmem>>, vector<1x8x32xf32>
    %155 = vector.shape_cast %154 : vector<1x8x32xf32> to vector<8x32xf32>
    %c1_67 = arith.constant 1 : index
    %c0_68 = arith.constant 0 : index
    %c0_69 = arith.constant 0 : index
    %156 = vector.load %arg4[%c1_67, %c0_68, %c0_69] : memref<2x8x32xf32, #tpu.memory_space<vmem>>, vector<1x8x32xf32>
    %157 = vector.shape_cast %156 : vector<1x8x32xf32> to vector<8x32xf32>
    %c1_70 = arith.constant 1 : index
    %c0_71 = arith.constant 0 : index
    %c0_72 = arith.constant 0 : index
    %158 = vector.load %arg7[%c1_70, %c0_71, %c0_72] : memref<2x8x32xf32, #tpu.memory_space<vmem>>, vector<1x8x32xf32>
    %159 = vector.shape_cast %158 : vector<1x8x32xf32> to vector<8x32xf32>
    %c1_73 = arith.constant 1 : index
    %c0_74 = arith.constant 0 : index
    %c0_75 = arith.constant 0 : index
    %160 = vector.load %arg8[%c1_73, %c0_74, %c0_75] : memref<2x8x32xf32, #tpu.memory_space<vmem>>, vector<1x8x32xf32>
    %161 = vector.shape_cast %160 : vector<1x8x32xf32> to vector<8x32xf32>
    %c1_76 = arith.constant 1 : index
    %c0_77 = arith.constant 0 : index
    %c0_78 = arith.constant 0 : index
    %162 = vector.load %arg5[%c1_76, %c0_77, %c0_78] : memref<2x32x96xf32, #tpu.memory_space<vmem>>, vector<1x32x96xf32>
    %163 = vector.shape_cast %162 : vector<1x32x96xf32> to vector<32x96xf32>
    %c1_79 = arith.constant 1 : index
    %c0_80 = arith.constant 0 : index
    %c0_81 = arith.constant 0 : index
    %164 = vector.load %arg6[%c1_79, %c0_80, %c0_81] : memref<2x1x96xf32, #tpu.memory_space<vmem>>, vector<1x1x96xf32>
    %165 = vector.shape_cast %164 : vector<1x1x96xf32> to vector<1x96xf32>
    %c1_82 = arith.constant 1 : index
    %c0_83 = arith.constant 0 : index
    %c0_84 = arith.constant 0 : index
    %166 = vector.load %arg9[%c1_82, %c0_83, %c0_84] : memref<2x32x128xf32, #tpu.memory_space<vmem>>, vector<1x32x128xf32>
    %167 = vector.shape_cast %166 : vector<1x32x128xf32> to vector<32x128xf32>
    %c1_85 = arith.constant 1 : index
    %c0_86 = arith.constant 0 : index
    %c0_87 = arith.constant 0 : index
    %168 = vector.load %arg10[%c1_85, %c0_86, %c0_87] : memref<2x1x128xf32, #tpu.memory_space<vmem>>, vector<1x1x128xf32>
    %169 = vector.shape_cast %168 : vector<1x1x128xf32> to vector<1x128xf32>
    %c1_88 = arith.constant 1 : index
    %c0_89 = arith.constant 0 : index
    %c0_90 = arith.constant 0 : index
    %170 = vector.load %arg11[%c1_88, %c0_89, %c0_90] : memref<2x128x32xf32, #tpu.memory_space<vmem>>, vector<1x128x32xf32>
    %171 = vector.shape_cast %170 : vector<1x128x32xf32> to vector<128x32xf32>
    %c1_91 = arith.constant 1 : index
    %c0_92 = arith.constant 0 : index
    %c0_93 = arith.constant 0 : index
    %172 = vector.load %arg12[%c1_91, %c0_92, %c0_93] : memref<2x1x32xf32, #tpu.memory_space<vmem>>, vector<1x1x32xf32>
    %173 = vector.shape_cast %172 : vector<1x1x32xf32> to vector<1x32xf32>
    %cst_94 = arith.constant dense<0.000000e+00> : vector<2x32xf32>
    %174 = vector.multi_reduction <add>, %153, %cst_94 [1] : vector<2x8x32xf32> to vector<2x32xf32>
    %175 = vector.shape_cast %174 : vector<2x32xf32> to vector<2x1x32xf32>
    %cst_95 = arith.constant 8.000000e+00 : f32
    %176 = vector.broadcast %cst_95 : f32 to vector<2x1x32xf32>
    %177 = arith.divf %175, %176 : vector<2x1x32xf32>
    %178 = vector.broadcast %177 : vector<2x1x32xf32> to vector<2x8x32xf32>
    %179 = arith.subf %153, %178 : vector<2x8x32xf32>
    %180 = arith.mulf %179, %179 : vector<2x8x32xf32>
    %cst_96 = arith.constant dense<0.000000e+00> : vector<2x32xf32>
    %181 = vector.multi_reduction <add>, %180, %cst_96 [1] : vector<2x8x32xf32> to vector<2x32xf32>
    %182 = vector.shape_cast %181 : vector<2x32xf32> to vector<2x1x32xf32>
    %cst_97 = arith.constant 8.000000e+00 : f32
    %183 = vector.broadcast %cst_97 : f32 to vector<2x1x32xf32>
    %184 = arith.divf %182, %183 : vector<2x1x32xf32>
    %cst_98 = arith.constant 9.99999974E-6 : f32
    %185 = vector.broadcast %cst_98 : f32 to vector<2x1x32xf32>
    %186 = arith.addf %184, %185 : vector<2x1x32xf32>
    %187 = math.rsqrt %186 : vector<2x1x32xf32>
    %188 = vector.broadcast %187 : vector<2x1x32xf32> to vector<2x8x32xf32>
    %189 = arith.mulf %179, %188 : vector<2x8x32xf32>
    %190 = vector.shape_cast %155 : vector<8x32xf32> to vector<1x8x32xf32>
    %191 = vector.broadcast %190 : vector<1x8x32xf32> to vector<2x8x32xf32>
    %192 = arith.mulf %189, %191 : vector<2x8x32xf32>
    %193 = vector.shape_cast %157 : vector<8x32xf32> to vector<1x8x32xf32>
    %194 = vector.broadcast %193 : vector<1x8x32xf32> to vector<2x8x32xf32>
    %195 = arith.addf %192, %194 : vector<2x8x32xf32>
    %196 = vector.shape_cast %195 : vector<2x8x32xf32> to vector<16x32xf32>
    %cst_99 = arith.constant dense<0.000000e+00> : vector<16x96xf32>
    %197 = tpu.matmul %196, %163, %cst_99 {dimension_numbers = #tpu.dot_dimension_numbers<[1], [0], [0], [1], [0, 0, 1, 1], [], []>} : vector<16x32xf32>, vector<32x96xf32>, vector<16x96xf32> -> vector<16x96xf32>
    %198 = vector.broadcast %165 : vector<1x96xf32> to vector<16x96xf32>
    %199 = arith.addf %197, %198 : vector<16x96xf32>
    %200 = vector.shape_cast %199 : vector<16x96xf32> to vector<2x8x96xf32>
    %201 = vector.extract_strided_slice %200 {offsets = [0, 0, 0], sizes = [2, 8, 32], strides = [1, 1, 1]} : vector<2x8x96xf32> to vector<2x8x32xf32>
    %cst_100 = arith.constant 0.353553385 : f32
    %202 = vector.broadcast %cst_100 : f32 to vector<2x8x32xf32>
    %203 = arith.mulf %201, %202 : vector<2x8x32xf32>
    %204 = vector.extract_strided_slice %200 {offsets = [0, 0, 32], sizes = [2, 8, 32], strides = [1, 1, 1]} : vector<2x8x96xf32> to vector<2x8x32xf32>
    %205 = vector.extract_strided_slice %200 {offsets = [0, 0, 64], sizes = [2, 8, 32], strides = [1, 1, 1]} : vector<2x8x96xf32> to vector<2x8x32xf32>
    %206 = vector.extract_strided_slice %203 {offsets = [0, 0, 0], sizes = [2, 8, 8], strides = [1, 1, 1]} : vector<2x8x32xf32> to vector<2x8x8xf32>
    %207 = vector.extract_strided_slice %204 {offsets = [0, 0, 0], sizes = [2, 8, 8], strides = [1, 1, 1]} : vector<2x8x32xf32> to vector<2x8x8xf32>
    %208 = vector.extract_strided_slice %205 {offsets = [0, 0, 0], sizes = [2, 8, 8], strides = [1, 1, 1]} : vector<2x8x32xf32> to vector<2x8x8xf32>
    "tpu.trace_start"() <{level = 10 : i32, message = "bnd,bmd->bnm"}> : () -> ()
    %cst_101 = arith.constant dense<0.000000e+00> : vector<2x8x8xf32>
    %209 = tpu.matmul %206, %207, %cst_101 {dimension_numbers = #tpu.dot_dimension_numbers<[2], [2], [1], [1], [0, 0, 0, 1, 1, 1], [0], [0]>} : vector<2x8x8xf32>, vector<2x8x8xf32>, vector<2x8x8xf32> -> vector<2x8x8xf32>
    "tpu.trace_stop"() : () -> ()
    %cst_102 = arith.constant dense<0xFF800000> : vector<2x8xf32>
    %210 = vector.multi_reduction <maximumf>, %209, %cst_102 [2] : vector<2x8x8xf32> to vector<2x8xf32>
    %211 = vector.shape_cast %210 : vector<2x8xf32> to vector<2x8x1xf32>
    %212 = vector.broadcast %211 : vector<2x8x1xf32> to vector<2x8x8xf32>
    %213 = arith.subf %209, %212 : vector<2x8x8xf32>
    %214 = math.exp %213 : vector<2x8x8xf32>
    %cst_103 = arith.constant dense<0.000000e+00> : vector<2x8xf32>
    %215 = vector.multi_reduction <add>, %214, %cst_103 [2] : vector<2x8x8xf32> to vector<2x8xf32>
    %216 = vector.shape_cast %215 : vector<2x8xf32> to vector<2x8x1xf32>
    %217 = tpu.reciprocal %216 {approx = true} : vector<2x8x1xf32> -> vector<2x8x1xf32>
    %218 = vector.broadcast %217 : vector<2x8x1xf32> to vector<2x8x8xf32>
    %219 = arith.mulf %214, %218 : vector<2x8x8xf32>
    "tpu.trace_start"() <{level = 10 : i32, message = "bnm,bmd->bnd"}> : () -> ()
    %cst_104 = arith.constant dense<0.000000e+00> : vector<2x8x8xf32>
    %220 = tpu.matmul %219, %208, %cst_104 {dimension_numbers = #tpu.dot_dimension_numbers<[2], [1], [1], [2], [0, 0, 0, 1, 1, 2], [0], [0]>} : vector<2x8x8xf32>, vector<2x8x8xf32>, vector<2x8x8xf32> -> vector<2x8x8xf32>
    "tpu.trace_stop"() : () -> ()
    %221 = vector.extract_strided_slice %203 {offsets = [0, 0, 8], sizes = [2, 8, 8], strides = [1, 1, 1]} : vector<2x8x32xf32> to vector<2x8x8xf32>
    %222 = vector.extract_strided_slice %204 {offsets = [0, 0, 8], sizes = [2, 8, 8], strides = [1, 1, 1]} : vector<2x8x32xf32> to vector<2x8x8xf32>
    %223 = vector.extract_strided_slice %205 {offsets = [0, 0, 8], sizes = [2, 8, 8], strides = [1, 1, 1]} : vector<2x8x32xf32> to vector<2x8x8xf32>
    "tpu.trace_start"() <{level = 10 : i32, message = "bnd,bmd->bnm"}> : () -> ()
    %cst_105 = arith.constant dense<0.000000e+00> : vector<2x8x8xf32>
    %224 = tpu.matmul %221, %222, %cst_105 {dimension_numbers = #tpu.dot_dimension_numbers<[2], [2], [1], [1], [0, 0, 0, 1, 1, 1], [0], [0]>} : vector<2x8x8xf32>, vector<2x8x8xf32>, vector<2x8x8xf32> -> vector<2x8x8xf32>
    "tpu.trace_stop"() : () -> ()
    %cst_106 = arith.constant dense<0xFF800000> : vector<2x8xf32>
    %225 = vector.multi_reduction <maximumf>, %224, %cst_106 [2] : vector<2x8x8xf32> to vector<2x8xf32>
    %226 = vector.shape_cast %225 : vector<2x8xf32> to vector<2x8x1xf32>
    %227 = vector.broadcast %226 : vector<2x8x1xf32> to vector<2x8x8xf32>
    %228 = arith.subf %224, %227 : vector<2x8x8xf32>
    %229 = math.exp %228 : vector<2x8x8xf32>
    %cst_107 = arith.constant dense<0.000000e+00> : vector<2x8xf32>
    %230 = vector.multi_reduction <add>, %229, %cst_107 [2] : vector<2x8x8xf32> to vector<2x8xf32>
    %231 = vector.shape_cast %230 : vector<2x8xf32> to vector<2x8x1xf32>
    %232 = tpu.reciprocal %231 {approx = true} : vector<2x8x1xf32> -> vector<2x8x1xf32>
    %233 = vector.broadcast %232 : vector<2x8x1xf32> to vector<2x8x8xf32>
    %234 = arith.mulf %229, %233 : vector<2x8x8xf32>
    "tpu.trace_start"() <{level = 10 : i32, message = "bnm,bmd->bnd"}> : () -> ()
    %cst_108 = arith.constant dense<0.000000e+00> : vector<2x8x8xf32>
    %235 = tpu.matmul %234, %223, %cst_108 {dimension_numbers = #tpu.dot_dimension_numbers<[2], [1], [1], [2], [0, 0, 0, 1, 1, 2], [0], [0]>} : vector<2x8x8xf32>, vector<2x8x8xf32>, vector<2x8x8xf32> -> vector<2x8x8xf32>
    "tpu.trace_stop"() : () -> ()
    %236 = vector.extract_strided_slice %203 {offsets = [0, 0, 16], sizes = [2, 8, 8], strides = [1, 1, 1]} : vector<2x8x32xf32> to vector<2x8x8xf32>
    %237 = vector.extract_strided_slice %204 {offsets = [0, 0, 16], sizes = [2, 8, 8], strides = [1, 1, 1]} : vector<2x8x32xf32> to vector<2x8x8xf32>
    %238 = vector.extract_strided_slice %205 {offsets = [0, 0, 16], sizes = [2, 8, 8], strides = [1, 1, 1]} : vector<2x8x32xf32> to vector<2x8x8xf32>
    "tpu.trace_start"() <{level = 10 : i32, message = "bnd,bmd->bnm"}> : () -> ()
    %cst_109 = arith.constant dense<0.000000e+00> : vector<2x8x8xf32>
    %239 = tpu.matmul %236, %237, %cst_109 {dimension_numbers = #tpu.dot_dimension_numbers<[2], [2], [1], [1], [0, 0, 0, 1, 1, 1], [0], [0]>} : vector<2x8x8xf32>, vector<2x8x8xf32>, vector<2x8x8xf32> -> vector<2x8x8xf32>
    "tpu.trace_stop"() : () -> ()
    %cst_110 = arith.constant dense<0xFF800000> : vector<2x8xf32>
    %240 = vector.multi_reduction <maximumf>, %239, %cst_110 [2] : vector<2x8x8xf32> to vector<2x8xf32>
    %241 = vector.shape_cast %240 : vector<2x8xf32> to vector<2x8x1xf32>
    %242 = vector.broadcast %241 : vector<2x8x1xf32> to vector<2x8x8xf32>
    %243 = arith.subf %239, %242 : vector<2x8x8xf32>
    %244 = math.exp %243 : vector<2x8x8xf32>
    %cst_111 = arith.constant dense<0.000000e+00> : vector<2x8xf32>
    %245 = vector.multi_reduction <add>, %244, %cst_111 [2] : vector<2x8x8xf32> to vector<2x8xf32>
    %246 = vector.shape_cast %245 : vector<2x8xf32> to vector<2x8x1xf32>
    %247 = tpu.reciprocal %246 {approx = true} : vector<2x8x1xf32> -> vector<2x8x1xf32>
    %248 = vector.broadcast %247 : vector<2x8x1xf32> to vector<2x8x8xf32>
    %249 = arith.mulf %244, %248 : vector<2x8x8xf32>
    "tpu.trace_start"() <{level = 10 : i32, message = "bnm,bmd->bnd"}> : () -> ()
    %cst_112 = arith.constant dense<0.000000e+00> : vector<2x8x8xf32>
    %250 = tpu.matmul %249, %238, %cst_112 {dimension_numbers = #tpu.dot_dimension_numbers<[2], [1], [1], [2], [0, 0, 0, 1, 1, 2], [0], [0]>} : vector<2x8x8xf32>, vector<2x8x8xf32>, vector<2x8x8xf32> -> vector<2x8x8xf32>
    "tpu.trace_stop"() : () -> ()
    %251 = vector.extract_strided_slice %203 {offsets = [0, 0, 24], sizes = [2, 8, 8], strides = [1, 1, 1]} : vector<2x8x32xf32> to vector<2x8x8xf32>
    %252 = vector.extract_strided_slice %204 {offsets = [0, 0, 24], sizes = [2, 8, 8], strides = [1, 1, 1]} : vector<2x8x32xf32> to vector<2x8x8xf32>
    %253 = vector.extract_strided_slice %205 {offsets = [0, 0, 24], sizes = [2, 8, 8], strides = [1, 1, 1]} : vector<2x8x32xf32> to vector<2x8x8xf32>
    "tpu.trace_start"() <{level = 10 : i32, message = "bnd,bmd->bnm"}> : () -> ()
    %cst_113 = arith.constant dense<0.000000e+00> : vector<2x8x8xf32>
    %254 = tpu.matmul %251, %252, %cst_113 {dimension_numbers = #tpu.dot_dimension_numbers<[2], [2], [1], [1], [0, 0, 0, 1, 1, 1], [0], [0]>} : vector<2x8x8xf32>, vector<2x8x8xf32>, vector<2x8x8xf32> -> vector<2x8x8xf32>
    "tpu.trace_stop"() : () -> ()
    %cst_114 = arith.constant dense<0xFF800000> : vector<2x8xf32>
    %255 = vector.multi_reduction <maximumf>, %254, %cst_114 [2] : vector<2x8x8xf32> to vector<2x8xf32>
    %256 = vector.shape_cast %255 : vector<2x8xf32> to vector<2x8x1xf32>
    %257 = vector.broadcast %256 : vector<2x8x1xf32> to vector<2x8x8xf32>
    %258 = arith.subf %254, %257 : vector<2x8x8xf32>
    %259 = math.exp %258 : vector<2x8x8xf32>
    %cst_115 = arith.constant dense<0.000000e+00> : vector<2x8xf32>
    %260 = vector.multi_reduction <add>, %259, %cst_115 [2] : vector<2x8x8xf32> to vector<2x8xf32>
    %261 = vector.shape_cast %260 : vector<2x8xf32> to vector<2x8x1xf32>
    %262 = tpu.reciprocal %261 {approx = true} : vector<2x8x1xf32> -> vector<2x8x1xf32>
    %263 = vector.broadcast %262 : vector<2x8x1xf32> to vector<2x8x8xf32>
    %264 = arith.mulf %259, %263 : vector<2x8x8xf32>
    "tpu.trace_start"() <{level = 10 : i32, message = "bnm,bmd->bnd"}> : () -> ()
    %cst_116 = arith.constant dense<0.000000e+00> : vector<2x8x8xf32>
    %265 = tpu.matmul %264, %253, %cst_116 {dimension_numbers = #tpu.dot_dimension_numbers<[2], [1], [1], [2], [0, 0, 0, 1, 1, 2], [0], [0]>} : vector<2x8x8xf32>, vector<2x8x8xf32>, vector<2x8x8xf32> -> vector<2x8x8xf32>
    "tpu.trace_stop"() : () -> ()
    %266 = tpu.concatenate %220, %235, %250, %265 in 2 : vector<2x8x8xf32>, vector<2x8x8xf32>, vector<2x8x8xf32>, vector<2x8x8xf32> -> vector<2x8x32xf32>
    %267 = arith.addf %153, %266 : vector<2x8x32xf32>
    %cst_117 = arith.constant dense<0.000000e+00> : vector<2x32xf32>
    %268 = vector.multi_reduction <add>, %267, %cst_117 [1] : vector<2x8x32xf32> to vector<2x32xf32>
    %269 = vector.shape_cast %268 : vector<2x32xf32> to vector<2x1x32xf32>
    %cst_118 = arith.constant 8.000000e+00 : f32
    %270 = vector.broadcast %cst_118 : f32 to vector<2x1x32xf32>
    %271 = arith.divf %269, %270 : vector<2x1x32xf32>
    %272 = vector.broadcast %271 : vector<2x1x32xf32> to vector<2x8x32xf32>
    %273 = arith.subf %267, %272 : vector<2x8x32xf32>
    %274 = arith.mulf %273, %273 : vector<2x8x32xf32>
    %cst_119 = arith.constant dense<0.000000e+00> : vector<2x32xf32>
    %275 = vector.multi_reduction <add>, %274, %cst_119 [1] : vector<2x8x32xf32> to vector<2x32xf32>
    %276 = vector.shape_cast %275 : vector<2x32xf32> to vector<2x1x32xf32>
    %cst_120 = arith.constant 8.000000e+00 : f32
    %277 = vector.broadcast %cst_120 : f32 to vector<2x1x32xf32>
    %278 = arith.divf %276, %277 : vector<2x1x32xf32>
    %cst_121 = arith.constant 9.99999974E-6 : f32
    %279 = vector.broadcast %cst_121 : f32 to vector<2x1x32xf32>
    %280 = arith.addf %278, %279 : vector<2x1x32xf32>
    %281 = math.rsqrt %280 : vector<2x1x32xf32>
    %282 = vector.broadcast %281 : vector<2x1x32xf32> to vector<2x8x32xf32>
    %283 = arith.mulf %273, %282 : vector<2x8x32xf32>
    %284 = vector.shape_cast %159 : vector<8x32xf32> to vector<1x8x32xf32>
    %285 = vector.broadcast %284 : vector<1x8x32xf32> to vector<2x8x32xf32>
    %286 = arith.mulf %283, %285 : vector<2x8x32xf32>
    %287 = vector.shape_cast %161 : vector<8x32xf32> to vector<1x8x32xf32>
    %288 = vector.broadcast %287 : vector<1x8x32xf32> to vector<2x8x32xf32>
    %289 = arith.addf %286, %288 : vector<2x8x32xf32>
    %290 = vector.shape_cast %289 : vector<2x8x32xf32> to vector<16x32xf32>
    %cst_122 = arith.constant dense<0.000000e+00> : vector<16x128xf32>
    %291 = tpu.matmul %290, %167, %cst_122 {dimension_numbers = #tpu.dot_dimension_numbers<[1], [0], [0], [1], [0, 0, 1, 1], [], []>} : vector<16x32xf32>, vector<32x128xf32>, vector<16x128xf32> -> vector<16x128xf32>
    %292 = vector.broadcast %169 : vector<1x128xf32> to vector<16x128xf32>
    %293 = arith.addf %291, %292 : vector<16x128xf32>
    %cst_123 = arith.constant 0.000000e+00 : f32
    %294 = vector.broadcast %cst_123 : f32 to vector<16x128xf32>
    %295 = arith.maximumf %293, %294 : vector<16x128xf32>
    %cst_124 = arith.constant dense<0.000000e+00> : vector<16x32xf32>
    %296 = tpu.matmul %295, %171, %cst_124 {dimension_numbers = #tpu.dot_dimension_numbers<[1], [0], [0], [1], [0, 0, 1, 1], [], []>} : vector<16x128xf32>, vector<128x32xf32>, vector<16x32xf32> -> vector<16x32xf32>
    %297 = vector.broadcast %173 : vector<1x32xf32> to vector<16x32xf32>
    %298 = arith.addf %296, %297 : vector<16x32xf32>
    %299 = vector.shape_cast %298 : vector<16x32xf32> to vector<2x8x32xf32>
    %300 = arith.addf %267, %299 : vector<2x8x32xf32>
    %c0_125 = arith.constant 0 : index
    %c0_126 = arith.constant 0 : index
    %c0_127 = arith.constant 0 : index
    %301 = vector.load %arg13[%c0_125, %c0_126, %c0_127] : memref<2x8x32xf32, #tpu.memory_space<vmem>>, vector<2x8x32xf32>
    tpu.vector_store %arg13[%c0_125, %c0_126, %c0_127], %300 {strides = array<i32>} : memref<2x8x32xf32, #tpu.memory_space<vmem>>, vector<2x8x32xf32>,
    return
  }
  func.func @transform_0(%arg0: i32) -> (i32, i32, i32) {
    %c0_i32 = arith.constant 0 : i32
    %c0_i32_0 = arith.constant 0 : i32
    %c0_i32_1 = arith.constant 0 : i32
    %c0_i32_2 = arith.constant 0 : i32
    return %c0_i32, %c0_i32_0, %c0_i32_1 : i32, i32, i32
  }
  func.func @transform_1(%arg0: i32) -> (i32, i32) {
    %c0_i32 = arith.constant 0 : i32
    %c0_i32_0 = arith.constant 0 : i32
    %c0_i32_1 = arith.constant 0 : i32
    return %c0_i32, %c0_i32_0 : i32, i32
  }
  func.func @transform_2(%arg0: i32) -> (i32, i32, i32) {
    %c0_i32 = arith.constant 0 : i32
    %c0_i32_0 = arith.constant 0 : i32
    %c0_i32_1 = arith.constant 0 : i32
    %c0_i32_2 = arith.constant 0 : i32
    return %c0_i32, %c0_i32_0, %c0_i32_1 : i32, i32, i32
  }
  func.func @transform_3(%arg0: i32) -> (i32, i32, i32) {
    %c0_i32 = arith.constant 0 : i32
    %c0_i32_0 = arith.constant 0 : i32
    %c0_i32_1 = arith.constant 0 : i32
    %c0_i32_2 = arith.constant 0 : i32
    return %c0_i32, %c0_i32_0, %c0_i32_1 : i32, i32, i32
  }
  func.func @transform_4(%arg0: i32) -> (i32, i32, i32) {
    %c0_i32 = arith.constant 0 : i32
    %c0_i32_0 = arith.constant 0 : i32
    %c0_i32_1 = arith.constant 0 : i32
    %c0_i32_2 = arith.constant 0 : i32
    return %c0_i32, %c0_i32_0, %c0_i32_1 : i32, i32, i32
  }
  func.func @transform_5(%arg0: i32) -> (i32, i32, i32) {
    %c0_i32 = arith.constant 0 : i32
    %c0_i32_0 = arith.constant 0 : i32
    %c0_i32_1 = arith.constant 0 : i32
    %c0_i32_2 = arith.constant 0 : i32
    return %c0_i32, %c0_i32_0, %c0_i32_1 : i32, i32, i32
  }
  func.func @transform_6(%arg0: i32) -> (i32, i32, i32) {
    %c0_i32 = arith.constant 0 : i32
    %c0_i32_0 = arith.constant 0 : i32
    %c0_i32_1 = arith.constant 0 : i32
    %c0_i32_2 = arith.constant 0 : i32
    return %c0_i32, %c0_i32_0, %c0_i32_1 : i32, i32, i32
  }
  func.func @transform_7(%arg0: i32) -> (i32, i32, i32) {
    %c0_i32 = arith.constant 0 : i32
    %c0_i32_0 = arith.constant 0 : i32
    %c0_i32_1 = arith.constant 0 : i32
    %c0_i32_2 = arith.constant 0 : i32
    return %c0_i32, %c0_i32_0, %c0_i32_1 : i32, i32, i32
  }
  func.func @transform_8(%arg0: i32) -> (i32, i32, i32) {
    %c0_i32 = arith.constant 0 : i32
    %c0_i32_0 = arith.constant 0 : i32
    %c0_i32_1 = arith.constant 0 : i32
    %c0_i32_2 = arith.constant 0 : i32
    return %c0_i32, %c0_i32_0, %c0_i32_1 : i32, i32, i32
  }
  func.func @transform_9(%arg0: i32) -> (i32, i32, i32) {
    %c0_i32 = arith.constant 0 : i32
    %c0_i32_0 = arith.constant 0 : i32
    %c0_i32_1 = arith.constant 0 : i32
    %c0_i32_2 = arith.constant 0 : i32
    return %c0_i32, %c0_i32_0, %c0_i32_1 : i32, i32, i32
  }
  func.func @transform_10(%arg0: i32) -> (i32, i32, i32) {
    %c0_i32 = arith.constant 0 : i32
    %c0_i32_0 = arith.constant 0 : i32
    %c0_i32_1 = arith.constant 0 : i32
    %c0_i32_2 = arith.constant 0 : i32
    return %c0_i32, %c0_i32_0, %c0_i32_1 : i32, i32, i32
  }
  func.func @transform_11(%arg0: i32) -> (i32, i32, i32) {
    %c0_i32 = arith.constant 0 : i32
    %c0_i32_0 = arith.constant 0 : i32
    %c0_i32_1 = arith.constant 0 : i32
    %c0_i32_2 = arith.constant 0 : i32
    return %c0_i32, %c0_i32_0, %c0_i32_1 : i32, i32, i32
  }
  func.func @transform_12(%arg0: i32) -> (i32, i32, i32) {
    %c0_i32 = arith.constant 0 : i32
    %c0_i32_0 = arith.constant 0 : i32
    %c0_i32_1 = arith.constant 0 : i32
    %c0_i32_2 = arith.constant 0 : i32
    return %c0_i32, %c0_i32_0, %c0_i32_1 : i32, i32, i32
  }
}

</mosaic_0001>

<bundles_post_ra>
// kernel: tpu_custom_call.1
= control target key start
LH: loop header
LB: loop body
LE: loop exit
PB: predicated region body
PF: predicated region fallthrough
CT: control target
= control target key end

     0   :  { %vm80_vm0 = vcmask 261120   ;;  %s4849_s0 = inlined_call_operand.vmem [shape: f32[2,8,32], index: 0, kind: input, shape index: {}]   ;;  %s4850_s1 = inlined_call_operand.vmem [shape: f32[8,32], index: 1, kind: input, shape index: {}]   ;;  %s4851_s2 = inlined_call_operand.vmem [shape: f32[2,8,32], index: 2, kind: input, shape index: {}]   ;;  %s4852_s3 = inlined_call_operand.vmem [shape: f32[2,8,32], index: 3, kind: input, shape index: {}]   ;;  %s4853_s4 = inlined_call_operand.vmem [shape: f32[2,32,96], index: 4, kind: input, shape index: {}]   ;;  %s4854_s5 = inlined_call_operand.vmem [shape: f32[2,1,96], index: 5, kind: input, shape index: {}]   ;;  %s4855_s6 = inlined_call_operand.vmem [shape: f32[2,8,32], index: 6, kind: input, shape index: {}]   ;;  %s4856_s7 = inlined_call_operand.vmem [shape: f32[2,8,32], index: 7, kind: input, shape index: {}]   ;;  %s4857_s8 = inlined_call_operand.vmem [shape: f32[2,32,128], index: 8, kind: input, shape index: {}]   ;;  %s4858_s9 = inlined_call_operand.vmem [shape: f32[2,1,128], index: 9, kind: input, shape index: {}]   ;;  %s4859_s10 = inlined_call_operand.vmem [shape: f32[2,128,32], index: 10, kind: input, shape index: {}]   ;;  %s4860_s11 = inlined_call_operand.vmem [shape: f32[2,1,32], index: 11, kind: input, shape index: {}]   ;;  %s4861_s12 = inlined_call_operand.hbm [shape: f32[2,8,32], index: 12, kind: output, shape index: {}]  }
   0x1   :  { %v56_v0 = vld [vmem:[%s4853_s4 + $0x18] sm:$0xff]  ;;  %v55_v1 = vld [vmem:[%s4853_s4 + $0x10] sm:$0xff]  ;;  %v42_v2 = vld [vmem:[%s4849_s0] sm:$0xff] }
   0x2   :  { %3771 = vmatprep.subr.mxu0 %v56_v0  ;;  %v43_v3 = vld [vmem:[%s4849_s0 + $0x8] sm:$0xff]  ;;  %v44_v5 = vmul.f32 2.0, %v42_v2  ;;  %v46_v7 = vld [vmem:[%s4850_s1] sm:$0xff] }
   0x3   :  { %3772 = vmatpush3.msra.mxu0 %v56_v0  ;;  %v54_v4 = vld [vmem:[%s4853_s4 + $0x8] sm:$0xff]  ;;  %v45_v6 = vmul.f32 2.0, %v43_v3 }
   0x4   :  { %3773 = vmatprep.subr.mxu0 %v55_v1 }
   0x5   :  { %17 = vsyncpa [#allocation3], 0  ;;  %3774 = vmatpush3.msra.mxu0 %v55_v1  ;;  %v53_v8 = vld [vmem:[%s4853_s4] sm:$0xff]  ;;  %v4269_v9 = vadd.f32 %v46_v7, %v44_v5  ;;  %v4271_v10 = vadd.f32 %v46_v7, %v45_v6  ;;  %v4165_v59 = vmov 0.0   ;;  %vm4166_vm1 = vmmov 0   ;;  %s4167_s21 = smov 96  }
   0x6   :  { %3775 = vmatprep.subr.mxu0 %v54_v4  ;;  %v49_v50 = vld [vmem:[%s4851_s2] sm:$0xff]  ;;  %3807 = vmatprep.subr.mxu1 %v4165_v59  ;;  %vm220_vm2 = vcmask 64512   ;;  %s4168_s22 = smov 64   ;;  %s4169_s23 = smov 88   ;;  %vm1564_vm3 = vcmask 130048   ;;  %vm1567_vm4 = vcmask 195584  }
   0x7   :  { %3776 = vmatpush3.msra.mxu0 %v54_v4  ;;  %v81_v11 = vsel %vm80_vm0, %v4269_v9, 0.0  ;;  %v88_v12 = vsel %vm80_vm0, %v4271_v10, 0.0  ;;  %v50_v53 = vld [vmem:[%s4852_s3] sm:$0xff]  ;;  %3809 = vmatprep.mubr.msk.f32.mxu1 %vm4166_vm1, %v4165_v59  ;;  %s4170_s24 = smov 120   ;;  %s4171_s25 = smov 56  }
   0x8   :  { %3777 = vmatprep.subr.mxu0 %v53_v8  ;;  %v82_v13 = vrot.slane %v81_v11, 4  ;;  %v89_v14 = vrot.slane %v88_v12, 4  ;;  %v3554_v61 = vld [vmem:[%s4854_s5] ss:$0 sm:$0xff]  ;;  %s4172_s26 = smov 112   ;;  %s4173_s27 = smov 80  }
   0x9   :  { %3778 = vmatpush3.msra.mxu0 %v53_v8  ;;  %s4174_s28 = smov 48   ;;  %s4175_s29 = smov 72  }
   0xa   :  { %v83_v15 = vadd.f32 %v82_v13, %v81_v11  ;;  %v90_v16 = vadd.f32 %v89_v14, %v88_v12  ;;  %3782 = vmatprep.subr.mxu0 %v4165_v59  ;;  %s4176_s30 = smov 104   ;;  %s4177_s13 = smov 40  }
   0xb   :  { %s4864_s14 = smov 8   ;;  %s4862_s15 = smov 16  }
   0xc   :  { %v84_v17 = vrot.slane %v83_v15, 2  ;;  %v91_v18 = vrot.slane %v90_v16, 2  ;;  %s4180_s16 = smov 24  }
   0xe   :  { %v85_v19 = vadd.f32 %v84_v17, %v83_v15  ;;  %v92_v20 = vadd.f32 %v91_v18, %v90_v16 }
  0x10   :  { %v86_v21 = vrot.slane %v85_v19, 1  ;;  %v93_v22 = vrot.slane %v92_v20, 1 }
  0x12   :  { %v87_v23 = vadd.f32 %v86_v21, %v85_v19  ;;  %v94_v24 = vadd.f32 %v93_v22, %v92_v20 }
  0x14   :  { %v96_v25 = vmul.f32 0.125, %v87_v23  ;;  %v97_v26 = vmul.f32 0.125, %v94_v24 }
  0x16   :  { %v98_v27 = vsub.f32 %v4269_v9, %v96_v25  ;;  %v99_v28 = vsub.f32 %v4271_v10, %v97_v26 }
  0x18   :  { %v100_v29 = vmul.f32 %v98_v27, %v98_v27  ;;  %v101_v30 = vmul.f32 %v99_v28, %v99_v28 }
  0x1a   :  { %v102_v31 = vsel %vm80_vm0, %v100_v29, 0.0  ;;  %v109_v32 = vsel %vm80_vm0, %v101_v30, 0.0 }
  0x1b   :  { %v103_v33 = vrot.slane %v102_v31, 4  ;;  %v110_v34 = vrot.slane %v109_v32, 4 }
  0x1d   :  { %v104_v35 = vadd.f32 %v103_v33, %v102_v31  ;;  %v111_v36 = vadd.f32 %v110_v34, %v109_v32 }
  0x1f   :  { %v105_v37 = vrot.slane %v104_v35, 2  ;;  %v112_v38 = vrot.slane %v111_v36, 2 }
  0x21   :  { %v106_v39 = vadd.f32 %v105_v37, %v104_v35  ;;  %v113_v40 = vadd.f32 %v112_v38, %v111_v36 }
  0x23   :  { %v107_v41 = vrot.slane %v106_v39, 1  ;;  %v114_v42 = vrot.slane %v113_v40, 1 }
  0x25   :  { %v108_v43 = vadd.f32 %v107_v41, %v106_v39  ;;  %v115_v44 = vadd.f32 %v114_v42, %v113_v40 }
  0x27   :  { %v116_v45 = vmul.f32 0.125, %v108_v43  ;;  %v117_v46 = vmul.f32 0.125, %v115_v44 }
  0x29   :  { %v118_v47 = vadd.f32 1e-05, %v116_v45  ;;  %v119_v48 = vadd.f32 1e-05, %v117_v46 }
  0x2b   :  { %4063 = vrsqrt.f32 %v118_v47 }
  0x2c   :  { %4065 = vrsqrt.f32 %v119_v48 }
  0x38   :  { %v4064_v49 = vpop.eup %4063 }
  0x39   :  { %v4066_v51 = vpop.eup %4065  ;;  %v122_v52 = vmul.f32 %v4064_v49, %v98_v27 }
  0x3a   :  { %v123_v54 = vmul.f32 %v4066_v51, %v99_v28 }
  0x3b   :  { %v124_v55 = vmul.f32 %v122_v52, %v49_v50 }
  0x3c   :  { %v125_v56 = vmul.f32 %v123_v54, %v49_v50 }
  0x3d   :  { %v126_v57 = vadd.f32 %v124_v55, %v50_v53 }
  0x3e   :  { %v127_v58 = vadd.f32 %v125_v56, %v50_v53 }
  0x3f   :  { %3779 = vmatprep.mubr.msk.f32.mxu0 %vm80_vm0, %v126_v57 }
  0x40   :  { %3780 = vmatmul.mubr.msk.f32.vlgmr.msra.gmra.mxu0 %vm80_vm0, %v127_v58 }
  0x41   :  { %3784 = vmatprep.mubr.msk.f32.mxu0 %vm4166_vm1, %v4165_v59 }
 0x100   :  { %v3781_v60 = vpop.f32.mrf.mxu0 }
 0x101   :  { %v4302_v0 = vadd.f32 %v3781_v60, %v3554_v61 }
 0x102   :  { %v206_v62 = vpop.f32.mrf.mxu0 }
 0x103   :  { %v4298_v63 = vadd.f32 %v3554_v61, %v206_v62  ;;  %v4317_v4 = vmul.f32 0.35355338, %v4302_v0 }
 0x105   :  { %218 = vrot.lane.b32.xlu0 %v4298_v63, %s4167_s21  ;;  %v4309_v2 = vmul.f32 0.35355338, %v4298_v63 }
 0x109   :  { %297 = vrot.lane.b32.xlu0 %v4302_v0, %s4167_s21 }
 0x177   :  { %v219_v1 = vpop.permute.xlu0 %218 }
 0x178   :  { %3783 = vmatpush3.xpose.msk.msra.mxu0 %vm220_vm2, %v219_v1 }
 0x179   :  { %3787 = vmatprep.subr.mxu0 %v4165_v59 }
 0x17b   :  { %v298_v3 = vpop.permute.xlu0 %297  ;;  %3785 = vmatmul.mubr.msk.f32.vlgmr.msra.gmra.mxu0 %vm220_vm2, %v4309_v2 }
 0x17c   :  { %3788 = vmatpush3.xpose.msk.msra.mxu0 %vm220_vm2, %v298_v3  ;;  %3789 = vmatprep.mubr.msk.f32.mxu0 %vm4166_vm1, %v4165_v59 }
 0x17d   :  { %3792 = vmatprep.subr.mxu0 %v4165_v59 }
 0x17f   :  { %3790 = vmatmul.mubr.msk.f32.vlgmr.msra.gmra.mxu0 %vm220_vm2, %v4317_v4 }
 0x180   :  { %3794 = vmatprep.mubr.msk.f32.mxu0 %vm4166_vm1, %v4165_v59 }
 0x23b   :  { %v292_v5 = vpop.f32.mrf.mxu0 }
 0x23c   :  { %v374_v6 = vsel %vm220_vm2, %v292_v5, -inf }
 0x23d   :  { %375 = vmax.xlane.f32.xlu1 %v374_v6  ;;  %v3786_v7 = vpop.f32.mrf.mxu0 }
 0x23f   :  { %v370_v8 = vpop.f32.mrf.mxu0 }
 0x240   :  { %v377_v11 = vsel %vm220_vm2, %v370_v8, -inf }
 0x241   :  { %378 = vmax.xlane.f32.xlu1 %v377_v11  ;;  %v3791_v12 = vpop.f32.mrf.mxu0 }
 0x252   :  { %396 = vrot.lane.b32.xlu1 %v4298_v63, %s4168_s22 }
 0x256   :  { %472 = vrot.lane.b32.xlu1 %v4302_v0, %s4168_s22 }
 0x25a   :  { %550 = vrot.lane.b32.xlu1 %v4298_v63, %s4169_s23 }
 0x25e   :  { %628 = vrot.lane.b32.xlu1 %v4302_v0, %s4169_s23 }
 0x2c6   :  { %v376_v13 = vpop.xlane.xlu1 %375 }
 0x2c7   :  { %v380_v14 = vsub.f32 %v292_v5, %v376_v13 }
 0x2c9   :  { %v382_v15 = vmul.f32 1.442695, %v380_v14 }
 0x2ca   :  { %v379_v16 = vpop.xlane.xlu1 %378 }
 0x2cb   :  { %4067 = vpow2.f32 %v382_v15  ;;  %v381_v17 = vsub.f32 %v370_v8, %v379_v16 }
 0x2cd   :  { %v384_v18 = vmul.f32 1.442695, %v381_v17 }
 0x2ce   :  { %v397_v19 = vpop.permute.xlu1 %396 }
 0x2cf   :  { %4069 = vpow2.f32 %v384_v18  ;;  %3793 = vmatpush3.msra.mxu0 %v397_v19 }
 0x2d0   :  { %3797 = vmatprep.subr.mxu0 %v4165_v59 }
 0x2d2   :  { %v473_v20 = vpop.permute.xlu1 %472 }
 0x2d6   :  { %v551_v21 = vpop.permute.xlu1 %550 }
 0x2d8   :  { %v4068_v22 = vpop.eup %4067 }
 0x2d9   :  { %v386_v23 = vsel %vm220_vm2, %v4068_v22, 0.0 }
 0x2da   :  { %387 = vadd.xlane.f32.xlu0 %v386_v23  ;;  %v629_v24 = vpop.permute.xlu1 %628 }
 0x2db   :  { %3808 = vmatpush3.xpose.msk.msra.mxu1 %vm220_vm2, %v629_v24 }
 0x2dc   :  { %v4070_v25 = vpop.eup %4069  ;;  %3817 = vmatprep.subr.mxu1 %v4165_v59 }
 0x2dd   :  { %v389_v26 = vsel %vm220_vm2, %v4070_v25, 0.0 }
 0x2de   :  { %390 = vadd.xlane.f32.xlu1 %v389_v26 }
 0x2ef   :  { %626 = vrot.lane.b32.xlu1 %v4317_v4, %s4170_s24 }
 0x2f0   :  { %548 = vrot.lane.b32.xlu0 %v4309_v2, %s4170_s24 }
 0x363   :  { %v388_v27 = vpop.xlane.xlu0 %387 }
 0x364   :  { %4071 = vrcp.f32 %v388_v27 }
 0x367   :  { %v391_v28 = vpop.xlane.xlu1 %390  ;;  %v549_v34 = vpop.permute.xlu0 %548 }
 0x368   :  { %4073 = vrcp.f32 %v391_v28 }
 0x36b   :  { %v627_v29 = vpop.permute.xlu1 %626 }
 0x36c   :  { %3810 = vmatmul.mubr.msk.f32.vlgmr.msra.gmra.mxu1 %vm220_vm2, %v627_v29 }
 0x36d   :  { %3819 = vmatprep.mubr.msk.f32.mxu1 %vm4166_vm1, %v4165_v59 }
 0x371   :  { %v4072_v30 = vpop.eup %4071 }
 0x372   :  { %v394_v31 = vmul.f32 %v4072_v30, %v4068_v22 }
 0x374   :  { %3795 = vmatmul.mubr.msk.f32.vlgmr.msra.gmra.mxu0 %vm220_vm2, %v394_v31 }
 0x375   :  { %v4074_v32 = vpop.eup %4073  ;;  %3798 = vmatpush3.msra.mxu0 %v473_v20  ;;  %3799 = vmatprep.mubr.msk.f32.mxu0 %vm4166_vm1, %v4165_v59 }
 0x376   :  { %3802 = vmatprep.subr.mxu0 %v4165_v59  ;;  %v395_v33 = vmul.f32 %v4074_v32, %v4070_v25 }
 0x378   :  { %3800 = vmatmul.mubr.msk.f32.vlgmr.msra.gmra.mxu0 %vm220_vm2, %v395_v33 }
 0x379   :  { %3803 = vmatpush3.xpose.msk.msra.mxu0 %vm220_vm2, %v551_v21  ;;  %3804 = vmatprep.mubr.msk.f32.mxu0 %vm4166_vm1, %v4165_v59 }
 0x37a   :  { %3812 = vmatprep.subr.mxu0 %v4165_v59 }
 0x37c   :  { %3805 = vmatmul.mubr.msk.f32.vlgmr.msra.gmra.mxu0 %vm220_vm2, %v549_v34 }
 0x37d   :  { %3814 = vmatprep.mubr.msk.f32.mxu0 %vm4166_vm1, %v4165_v59 }
 0x42c   :  { %v700_v35 = vpop.f32.mrf.mxu1 }
 0x42d   :  { %v707_v36 = vsel %vm220_vm2, %v700_v35, -inf }
 0x42e   :  { %708 = vmax.xlane.f32.xlu0 %v707_v36  ;;  %v3811_v37 = vpop.f32.mrf.mxu1 }
 0x434   :  { %v4359_v38 = vpop.f32.mrf.mxu0 }
 0x436   :  { %v3796_v39 = vpop.f32.mrf.mxu0 }
 0x438   :  { %v4361_v40 = vpop.f32.mrf.mxu0 }
 0x43a   :  { %v3801_v41 = vpop.f32.mrf.mxu0 }
 0x43c   :  { %v622_v42 = vpop.f32.mrf.mxu0 }
 0x43d   :  { %v704_v43 = vsel %vm220_vm2, %v622_v42, -inf }
 0x43e   :  { %705 = vmax.xlane.f32.xlu1 %v704_v43  ;;  %v3806_v44 = vpop.f32.mrf.mxu0 }
 0x444   :  { %802 = vrot.lane.b32.xlu0 %v4302_v0, %s4171_s25 }
 0x448   :  { %878 = vrot.lane.b32.xlu0 %v4309_v2, %s4172_s26 }
 0x4b7   :  { %v709_v45 = vpop.xlane.xlu0 %708 }
 0x4b8   :  { %v711_v46 = vsub.f32 %v700_v35, %v709_v45 }
 0x4ba   :  { %v714_v47 = vmul.f32 1.442695, %v711_v46 }
 0x4bb   :  { %v803_v48 = vpop.permute.xlu0 %802 }
 0x4bc   :  { %4075 = vpow2.f32 %v714_v47  ;;  %3818 = vmatpush3.msra.mxu1 %v803_v48 }
 0x4bd   :  { %3827 = vmatprep.subr.mxu1 %v4165_v59 }
 0x4bf   :  { %v879_v7 = vpop.permute.xlu0 %878 }
 0x4c7   :  { %v706_v51 = vpop.xlane.xlu1 %705 }
 0x4c8   :  { %v710_v52 = vsub.f32 %v622_v42, %v706_v51 }
 0x4c9   :  { %v4076_v49 = vpop.eup %4075 }
 0x4ca   :  { %v719_v50 = vsel %vm220_vm2, %v4076_v49, 0.0  ;;  %v712_v53 = vmul.f32 1.442695, %v710_v52 }
 0x4cb   :  { %720 = vadd.xlane.f32.xlu1 %v719_v50 }
 0x4cc   :  { %4077 = vpow2.f32 %v712_v53 }
 0x4d9   :  { %v4078_v54 = vpop.eup %4077 }
 0x4da   :  { %v716_v55 = vsel %vm220_vm2, %v4078_v54, 0.0 }
 0x4dc   :  { %726 = vrot.lane.b32.xlu1 %v4298_v63, %s4171_s25 }
 0x4e0   :  { %880 = vrot.lane.b32.xlu1 %v4298_v63, %s4173_s27 }
 0x4e4   :  { %958 = vrot.lane.b32.xlu1 %v4302_v0, %s4173_s27 }
 0x508   :  { %717 = vadd.xlane.f32.xlu1 %v716_v55 }
 0x519   :  { %956 = vrot.lane.b32.xlu1 %v4317_v4, %s4172_s26 }
 0x554   :  { %v721_v56 = vpop.xlane.xlu1 %720 }
 0x555   :  { %4079 = vrcp.f32 %v721_v56 }
 0x558   :  { %v727_v57 = vpop.permute.xlu1 %726 }
 0x559   :  { %3813 = vmatpush3.msra.mxu0 %v727_v57 }
 0x55a   :  { %3822 = vmatprep.subr.mxu0 %v4165_v59 }
 0x55c   :  { %v881_v58 = vpop.permute.xlu1 %880 }
 0x560   :  { %v959_v62 = vpop.permute.xlu1 %958 }
 0x562   :  { %v4080_v60 = vpop.eup %4079 }
 0x563   :  { %v725_v61 = vmul.f32 %v4080_v60, %v4076_v49 }
 0x565   :  { %3820 = vmatmul.mubr.msk.f32.vlgmr.msra.gmra.mxu1 %vm220_vm2, %v725_v61 }
 0x566   :  { %3828 = vmatpush3.xpose.msk.msra.mxu1 %vm220_vm2, %v959_v62  ;;  %3829 = vmatprep.mubr.msk.f32.mxu1 %vm4166_vm1, %v4165_v59 }
 0x567   :  { %3837 = vmatprep.subr.mxu1 %v4165_v59 }
 0x591   :  { %v718_v1 = vpop.xlane.xlu1 %717 }
 0x592   :  { %4081 = vrcp.f32 %v718_v1 }
 0x595   :  { %v957_v3 = vpop.permute.xlu1 %956 }
 0x596   :  { %3830 = vmatmul.mubr.msk.f32.vlgmr.msra.gmra.mxu1 %vm220_vm2, %v957_v3 }
 0x597   :  { %3839 = vmatprep.mubr.msk.f32.mxu1 %vm4166_vm1, %v4165_v59 }
 0x59f   :  { %v4082_v5 = vpop.eup %4081 }
 0x5a0   :  { %v724_v6 = vmul.f32 %v4082_v5, %v4078_v54 }
 0x5a2   :  { %3815 = vmatmul.mubr.msk.f32.vlgmr.msra.gmra.mxu0 %vm220_vm2, %v724_v6 }
 0x5a3   :  { %3823 = vmatpush3.xpose.msk.msra.mxu0 %vm220_vm2, %v881_v58  ;;  %3824 = vmatprep.mubr.msk.f32.mxu0 %vm4166_vm1, %v4165_v59 }
 0x5a4   :  { %3832 = vmatprep.subr.mxu0 %v4165_v59 }
 0x5a6   :  { %3825 = vmatmul.mubr.msk.f32.vlgmr.msra.gmra.mxu0 %vm220_vm2, %v879_v7 }
 0x5a7   :  { %3834 = vmatprep.mubr.msk.f32.mxu0 %vm4166_vm1, %v4165_v59 }
 0x625   :  { %v4396_v8 = vpop.f32.mrf.mxu1 }
 0x627   :  { %v3821_v11 = vpop.f32.mrf.mxu1 }
 0x656   :  { %v1030_v12 = vpop.f32.mrf.mxu1 }
 0x657   :  { %v1037_v13 = vsel %vm220_vm2, %v1030_v12, -inf }
 0x658   :  { %1038 = vmax.xlane.f32.xlu1 %v1037_v13  ;;  %v3831_v14 = vpop.f32.mrf.mxu1 }
 0x662   :  { %v4399_v15 = vpop.f32.mrf.mxu0 }
 0x664   :  { %v3816_v16 = vpop.f32.mrf.mxu0 }
 0x665   :  { %v60_v16 = vld [vmem:[%s4857_s8 + $0x10] sm:$0xff] }
 0x666   :  { %v952_v17 = vpop.f32.mrf.mxu0 }
 0x667   :  { %v1034_v18 = vsel %vm220_vm2, %v952_v17, -inf }
 0x668   :  { %1035 = vmax.xlane.f32.xlu0 %v1034_v18  ;;  %v3826_v19 = vpop.f32.mrf.mxu0  ;;  %v58_v18 = vld [vmem:[%s4857_s8] sm:$0xff] }
 0x669   :  { %1056 = vrot.lane.b32.xlu1 %v4298_v63, %s4174_s28  ;;  %v78_v19 = vld [vmem:[%s4859_s10 + $0x78] sm:$0xff] }
 0x66d   :  { %1210 = vrot.lane.b32.xlu1 %v4298_v63, %s4175_s29 }
 0x671   :  { %1288 = vrot.lane.b32.xlu1 %v4302_v0, %s4175_s29 }
 0x675   :  { %1286 = vrot.lane.b32.xlu1 %v4317_v4, %s4176_s30 }
 0x6e1   :  { %v1039_v20 = vpop.xlane.xlu1 %1038 }
 0x6e2   :  { %v1041_v21 = vsub.f32 %v1030_v12, %v1039_v20  ;;  %v77_v20 = vld [vmem:[%s4859_s10 + $0x70] sm:$0xff] }
 0x6e4   :  { %v1044_v22 = vmul.f32 1.442695, %v1041_v21  ;;  %v76_v21 = vld [vmem:[%s4859_s10 + $0x68] sm:$0xff] }
 0x6e5   :  { %v1057_v23 = vpop.permute.xlu1 %1056 }
 0x6e6   :  { %4083 = vpow2.f32 %v1044_v22  ;;  %3833 = vmatpush3.msra.mxu0 %v1057_v23  ;;  %v75_v22 = vld [vmem:[%s4859_s10 + $0x60] sm:$0xff]  ;;  %v74_v23 = vld [vmem:[%s4859_s10 + $0x58] sm:$0xff] }
 0x6e7   :  { %3842 = vmatprep.subr.mxu0 %v4165_v59 }
 0x6e9   :  { %v1211_v31 = vpop.permute.xlu1 %1210 }
 0x6ed   :  { %v1289_v34 = vpop.permute.xlu1 %1288 }
 0x6f1   :  { %v1036_v24 = vpop.xlane.xlu0 %1035 }
 0x6f2   :  { %v1040_v25 = vsub.f32 %v952_v17, %v1036_v24  ;;  %v59_v17 = vld [vmem:[%s4857_s8 + $0x8] sm:$0xff]  ;;  %v73_v24 = vld [vmem:[%s4859_s10 + $0x50] sm:$0xff] }
 0x6f3   :  { %v4084_v26 = vpop.eup %4083 }
 0x6f4   :  { %v1042_v27 = vmul.f32 1.442695, %v1040_v25  ;;  %v1049_v28 = vsel %vm220_vm2, %v4084_v26, 0.0  ;;  %v72_v25 = vld [vmem:[%s4859_s10 + $0x48] sm:$0xff] }
 0x6f5   :  { %1050 = vadd.xlane.f32.xlu0 %v1049_v28  ;;  %v69_v28 = vld [vmem:[%s4859_s10 + $0x30] sm:$0xff] }
 0x6f6   :  { %4085 = vpow2.f32 %v1042_v27  ;;  %v70_v27 = vld [vmem:[%s4859_s10 + $0x38] sm:$0xff] }
 0x703   :  { %v4086_v29 = vpop.eup %4085 }
 0x704   :  { %v1046_v30 = vsel %vm220_vm2, %v4086_v29, 0.0 }
 0x705   :  { %1047 = vadd.xlane.f32.xlu0 %v1046_v30  ;;  %v67_v30 = vld [vmem:[%s4859_s10 + $0x20] sm:$0xff] }
 0x71b   :  { %1132 = vrot.lane.b32.xlu0 %v4302_v0, %s4174_s28 }
 0x71f   :  { %1208 = vrot.lane.b32.xlu0 %v4309_v2, %s4176_s30  ;;  %v1287_v2 = vpop.permute.xlu1 %1286 }
 0x77e   :  { %v1051_v4 = vpop.xlane.xlu0 %1050 }
 0x77f   :  { %4087 = vrcp.f32 %v1051_v4 }
 0x78c   :  { %v4088_v33 = vpop.eup %4087 }
 0x78d   :  { %v1055_v36 = vmul.f32 %v4088_v33, %v4084_v26  ;;  %v71_v26 = vld [vmem:[%s4859_s10 + $0x40] sm:$0xff] }
 0x78e   :  { %v1048_v32 = vpop.xlane.xlu0 %1047 }
 0x78f   :  { %4089 = vrcp.f32 %v1048_v32 }
 0x792   :  { %v1133_v35 = vpop.permute.xlu0 %1132 }
 0x793   :  { %3838 = vmatpush3.msra.mxu1 %v1133_v35 }
 0x794   :  { %3840 = vmatmul.mubr.msk.f32.vlgmr.msra.gmra.mxu1 %vm220_vm2, %v1055_v36  ;;  %3847 = vmatprep.subr.mxu1 %v4165_v59 }
 0x795   :  { %3848 = vmatpush3.xpose.msk.msra.mxu1 %vm220_vm2, %v1289_v34  ;;  %3849 = vmatprep.mubr.msk.f32.mxu1 %vm4166_vm1, %v4165_v59 }
 0x796   :  { %3857 = vmatprep.subr.mxu1 %v4165_v59  ;;  %v1209_v41 = vpop.permute.xlu0 %1208 }
 0x798   :  { %3850 = vmatmul.mubr.msk.f32.vlgmr.msra.gmra.mxu1 %vm220_vm2, %v1287_v2 }
 0x799   :  { %3859 = vmatprep.mubr.msk.f32.mxu1 %vm4166_vm1, %v4165_v59 }
 0x79c   :  { %v4090_v37 = vpop.eup %4089 }
 0x79d   :  { %v1054_v39 = vmul.f32 %v4090_v37, %v4086_v29  ;;  %v68_v29 = vld [vmem:[%s4859_s10 + $0x28] sm:$0xff] }
 0x79f   :  { %3835 = vmatmul.mubr.msk.f32.vlgmr.msra.gmra.mxu0 %vm220_vm2, %v1054_v39 }
 0x7a0   :  { %3843 = vmatpush3.xpose.msk.msra.mxu0 %vm220_vm2, %v1211_v31  ;;  %3844 = vmatprep.mubr.msk.f32.mxu0 %vm4166_vm1, %v4165_v59 }
 0x7a1   :  { %3852 = vmatprep.subr.mxu0 %v4165_v59 }
 0x7a3   :  { %3845 = vmatmul.mubr.msk.f32.vlgmr.msra.gmra.mxu0 %vm220_vm2, %v1209_v41 }
 0x7a4   :  { %3854 = vmatprep.mubr.msk.f32.mxu0 %vm4166_vm1, %v4165_v59 }
 0x854   :  { %v1204_v42 = vpop.f32.mrf.mxu1 }
 0x856   :  { %v3841_v43 = vpop.f32.mrf.mxu1 }
 0x858   :  { %v1360_v44 = vpop.f32.mrf.mxu1 }
 0x859   :  { %v1367_v45 = vsel %vm220_vm2, %v1360_v44, -inf }
 0x85a   :  { %1368 = vmax.xlane.f32.xlu1 %v1367_v45  ;;  %v3851_v46 = vpop.f32.mrf.mxu1 }
 0x85f   :  { %v1128_v47 = vpop.f32.mrf.mxu0 }
 0x861   :  { %v3836_v48 = vpop.f32.mrf.mxu0 }
 0x863   :  { %v1282_v49 = vpop.f32.mrf.mxu0 }
 0x864   :  { %v1364_v50 = vsel %vm220_vm2, %v1282_v49, -inf }
 0x865   :  { %1365 = vmax.xlane.f32.xlu0 %v1364_v50  ;;  %v3846_v51 = vpop.f32.mrf.mxu0 }
 0x86b   :  { %1386 = vrot.lane.b32.xlu1 %v4298_v63, %s4177_s13 }
 0x86f   :  { %1540 = vrot.lane.b32.xlu1 %v4399_v15, %s4864_s14  ;;  %v61_v15 = vld [vmem:[%s4857_s8 + $0x18] sm:$0xff] }
 0x873   :  { %1542 = vrot.lane.b32.xlu1 %v4396_v8, %s4864_s14 }
 0x877   :  { %1550 = vrot.lane.b32.xlu1 %v1204_v42, %s4862_s15 }
 0x8e3   :  { %v1369_v52 = vpop.xlane.xlu1 %1368 }
 0x8e4   :  { %v1371_v53 = vsub.f32 %v1360_v44, %v1369_v52 }
 0x8e6   :  { %v1374_v54 = vmul.f32 1.442695, %v1371_v53 }
 0x8e7   :  { %v1387_v55 = vpop.permute.xlu1 %1386 }
 0x8e8   :  { %4091 = vpow2.f32 %v1374_v54  ;;  %3853 = vmatpush3.msra.mxu0 %v1387_v55 }
 0x8e9   :  { %3862 = vmatprep.subr.mxu0 %v61_v15 }
 0x8eb   :  { %v1541_v4 = vpop.permute.xlu1 %1540 }
 0x8ec   :  { %v1562_v44 = vsel %vm220_vm2, %v4359_v38, %v1541_v4  ;;  %v65_v4 = vld [vmem:[%s4859_s10 + $0x10] sm:$0xff] }
 0x8ee   :  { %v1366_v56 = vpop.xlane.xlu0 %1365 }
 0x8ef   :  { %v1370_v57 = vsub.f32 %v1282_v49, %v1366_v56  ;;  %v1543_v31 = vpop.permute.xlu1 %1542 }
 0x8f0   :  { %v1563_v33 = vsel %vm220_vm2, %v4361_v40, %v1543_v31  ;;  %v64_v31 = vld [vmem:[%s4859_s10 + $0x8] sm:$0xff] }
 0x8f1   :  { %v1372_v58 = vmul.f32 1.442695, %v1370_v57 }
 0x8f3   :  { %4093 = vpow2.f32 %v1372_v58  ;;  %v1551_v32 = vpop.permute.xlu1 %1550 }
 0x8f4   :  { %v1566_v34 = vsel %vm1564_vm3, %v1563_v33, %v1551_v32  ;;  %v63_v32 = vld [vmem:[%s4859_s10] sm:$0xff] }
 0x8f5   :  { %v4092_v63 = vpop.eup %4091  ;;  %v3581_v33 = vld [vmem:[%s4858_s9] ss:$0 sm:$0xff] }
 0x8f6   :  { %v1379_v60 = vsel %vm220_vm2, %v4092_v63, 0.0 }
 0x8f7   :  { %1380 = vadd.xlane.f32.xlu0 %v1379_v60 }
 0x900   :  { %v4094_v61 = vpop.eup %4093 }
 0x901   :  { %v1376_v62 = vsel %vm220_vm2, %v4094_v61, 0.0 }
 0x902   :  { %1377 = vadd.xlane.f32.xlu0 %v1376_v62 }
 0x918   :  { %1462 = vrot.lane.b32.xlu0 %v4302_v0, %s4177_s13 }
 0x91c   :  { %1548 = vrot.lane.b32.xlu0 %v1128_v47, %s4862_s15 }
 0x980   :  { %v1381_v1 = vpop.xlane.xlu0 %1380 }
 0x981   :  { %4095 = vrcp.f32 %v1381_v1 }
 0x98b   :  { %v1378_v3 = vpop.xlane.xlu0 %1377 }
 0x98c   :  { %4097 = vrcp.f32 %v1378_v3 }
 0x98e   :  { %v4096_v5 = vpop.eup %4095 }
 0x98f   :  { %v1463_v6 = vpop.permute.xlu0 %1462  ;;  %v1385_v7 = vmul.f32 %v4096_v5, %v4092_v63 }
 0x990   :  { %3858 = vmatpush3.msra.mxu1 %v1463_v6 }
 0x991   :  { %3860 = vmatmul.mubr.msk.f32.vlgmr.msra.gmra.mxu1 %vm220_vm2, %v1385_v7  ;;  %3873 = vmatprep.subr.mxu1 %v78_v19 }
 0x992   :  { %3874 = vmatpush3.msra.mxu1 %v78_v19 }
 0x993   :  { %3875 = vmatprep.subr.mxu1 %v77_v20  ;;  %v1549_v41 = vpop.permute.xlu0 %1548 }
 0x994   :  { %3876 = vmatpush3.msra.mxu1 %v77_v20  ;;  %v1565_v40 = vsel %vm1564_vm3, %v1562_v44, %v1549_v41  ;;  %v3590_v44 = vld [vmem:[%s4853_s4 + $0x28] sm:$0xff] }
 0x995   :  { %3877 = vmatprep.subr.mxu1 %v76_v21 }
 0x996   :  { %3878 = vmatpush3.msra.mxu1 %v76_v21 }
 0x997   :  { %3879 = vmatprep.subr.mxu1 %v75_v22 }
 0x998   :  { %3880 = vmatpush3.msra.mxu1 %v75_v22  ;;  %v51_v22 = vld [vmem:[%s4855_s6] sm:$0xff] }
 0x999   :  { %v4098_v8 = vpop.eup %4097  ;;  %3881 = vmatprep.subr.mxu1 %v74_v23 }
 0x99a   :  { %v1384_v11 = vmul.f32 %v4098_v8, %v4094_v61  ;;  %3882 = vmatpush3.msra.mxu1 %v74_v23 }
 0x99b   :  { %3883 = vmatprep.subr.mxu1 %v73_v24 }
 0x99c   :  { %3855 = vmatmul.mubr.msk.f32.vlgmr.msra.gmra.mxu0 %vm220_vm2, %v1384_v11  ;;  %3884 = vmatpush3.msra.mxu1 %v73_v24 }
 0x99d   :  { %3863 = vmatpush3.msra.mxu0 %v61_v15  ;;  %3885 = vmatprep.subr.mxu1 %v72_v25 }
 0x99e   :  { %3864 = vmatprep.subr.mxu0 %v60_v16  ;;  %3886 = vmatpush3.msra.mxu1 %v72_v25 }
 0x99f   :  { %3865 = vmatpush3.msra.mxu0 %v60_v16  ;;  %3887 = vmatprep.subr.mxu1 %v71_v26 }
 0x9a0   :  { %3866 = vmatprep.subr.mxu0 %v59_v17  ;;  %3888 = vmatpush3.msra.mxu1 %v71_v26  ;;  %v52_v26 = vld [vmem:[%s4856_s7] sm:$0xff] }
 0x9a1   :  { %3867 = vmatpush3.msra.mxu0 %v59_v17  ;;  %3889 = vmatprep.subr.mxu1 %v70_v27 }
 0x9a2   :  { %3868 = vmatprep.subr.mxu0 %v58_v18  ;;  %3890 = vmatpush3.msra.mxu1 %v70_v27 }
 0x9a3   :  { %3869 = vmatpush3.msra.mxu0 %v58_v18  ;;  %3891 = vmatprep.subr.mxu1 %v69_v28 }
 0x9a4   :  { %3892 = vmatpush3.msra.mxu1 %v69_v28 }
 0x9a5   :  { %3893 = vmatprep.subr.mxu1 %v68_v29 }
 0x9a6   :  { %3894 = vmatpush3.msra.mxu1 %v68_v29 }
 0x9a7   :  { %3895 = vmatprep.subr.mxu1 %v67_v30 }
 0x9a8   :  { %3896 = vmatpush3.msra.mxu1 %v67_v30  ;;  %v66_v30 = vld [vmem:[%s4859_s10 + $0x18] sm:$0xff] }
 0x9a9   :  { %3897 = vmatprep.subr.mxu1 %v66_v30 }
 0x9aa   :  { %3898 = vmatpush3.msra.mxu1 %v66_v30 }
 0x9ab   :  { %3899 = vmatprep.subr.mxu1 %v65_v4 }
 0x9ac   :  { %3900 = vmatpush3.msra.mxu1 %v65_v4 }
 0x9ad   :  { %3901 = vmatprep.subr.mxu1 %v64_v31 }
 0x9ae   :  { %3902 = vmatpush3.msra.mxu1 %v64_v31 }
 0x9af   :  { %3903 = vmatprep.subr.mxu1 %v63_v32 }
 0x9b0   :  { %3904 = vmatpush3.msra.mxu1 %v63_v32  ;;  %v3586_v32 = vld [vmem:[%s4852_s3 + $0x8] sm:$0xff]  ;;  %s4867_s3 = smov 16  }
 0x9b1   :  { %3944 = vmatprep.subr.mxu1 %v4165_v59 }
 0xa51   :  { %v1534_v12 = vpop.f32.mrf.mxu1 }
 0xa52   :  { %1558 = vrot.lane.b32.xlu1 %v1534_v12, %s4180_s16 }
 0xa53   :  { %v3861_v0 = vpop.f32.mrf.mxu1 }
 0xa5c   :  { %v1458_v13 = vpop.f32.mrf.mxu0 }
 0xa5d   :  { %1556 = vrot.lane.b32.xlu0 %v1458_v13, %s4180_s16 }
 0xa5e   :  { %v3856_v14 = vpop.f32.mrf.mxu0 }
 0xac4   :  { %v1559_v35 = vpop.permute.xlu1 %1558 }
 0xac5   :  { %v1569_v36 = vsel %vm1567_vm4, %v1566_v34, %v1559_v35 }
 0xac6   :  { %v4505_v2 = vadd.f32 %v1569_v36, %v4271_v10 }
 0xac8   :  { %v1579_v37 = vsel %vm80_vm0, %v4505_v2, 0.0 }
 0xac9   :  { %v1580_v39 = vrot.slane %v1579_v37, 4 }
 0xacb   :  { %v1581_v42 = vadd.f32 %v1580_v39, %v1579_v37 }
 0xacd   :  { %v1582_v43 = vrot.slane %v1581_v42, 2 }
 0xacf   :  { %v1583_v45 = vadd.f32 %v1582_v43, %v1581_v42  ;;  %v1557_v46 = vpop.permute.xlu0 %1556  ;;  %v3592_v42 = vld [vmem:[%s4853_s4 + $0x38] sm:$0xff]  ;;  %v3591_v43 = vld [vmem:[%s4853_s4 + $0x30] sm:$0xff] }
 0xad0   :  { %v1568_v47 = vsel %vm1567_vm4, %v1565_v40, %v1557_v46  ;;  %3908 = vmatprep.subr.mxu0 %v3592_v42  ;;  %v3589_v40 = vld [vmem:[%s4853_s4 + $0x20] sm:$0xff] }
 0xad1   :  { %v1584_v48 = vrot.slane %v1583_v45, 1  ;;  %v4514_v10 = vadd.f32 %v1568_v47, %v4269_v9 }
 0xad3   :  { %v1585_v49 = vadd.f32 %v1584_v48, %v1583_v45  ;;  %v1572_v50 = vsel %vm80_vm0, %v4514_v10, 0.0  ;;  %v3584_v45 = vld [vmem:[%s4860_s11] ss:$0 sm:$0xff] }
 0xad4   :  { %v1573_v51 = vrot.slane %v1572_v50, 4 }
 0xad5   :  { %v1587_v52 = vmul.f32 0.125, %v1585_v49 }
 0xad6   :  { %v1574_v53 = vadd.f32 %v1573_v51, %v1572_v50 }
 0xad7   :  { %v1589_v54 = vsub.f32 %v4505_v2, %v1587_v52 }
 0xad8   :  { %v1575_v38 = vrot.slane %v1574_v53, 2 }
 0xad9   :  { %v1591_v55 = vmul.f32 %v1589_v54, %v1589_v54 }
 0xada   :  { %v1576_v56 = vadd.f32 %v1575_v38, %v1574_v53 }
 0xadb   :  { %v1599_v57 = vsel %vm80_vm0, %v1591_v55, 0.0 }
 0xadc   :  { %v1600_v58 = vrot.slane %v1599_v57, 4  ;;  %v1577_v63 = vrot.slane %v1576_v56, 1 }
 0xade   :  { %v1601_v60 = vadd.f32 %v1600_v58, %v1599_v57  ;;  %v1578_v61 = vadd.f32 %v1577_v63, %v1576_v56 }
 0xae0   :  { %v1602_v9 = vrot.slane %v1601_v60, 2  ;;  %v1586_v62 = vmul.f32 0.125, %v1578_v61 }
 0xae2   :  { %v1603_v1 = vadd.f32 %v1602_v9, %v1601_v60  ;;  %v1588_v3 = vsub.f32 %v4514_v10, %v1586_v62 }
 0xae4   :  { %v1604_v5 = vrot.slane %v1603_v1, 1  ;;  %v1590_v6 = vmul.f32 %v1588_v3, %v1588_v3 }
 0xae6   :  { %v1605_v7 = vadd.f32 %v1604_v5, %v1603_v1  ;;  %v1592_v8 = vsel %vm80_vm0, %v1590_v6, 0.0 }
 0xae7   :  { %v1593_v11 = vrot.slane %v1592_v8, 4 }
 0xae8   :  { %v1607_v0 = vmul.f32 0.125, %v1605_v7 }
 0xae9   :  { %v1594_v12 = vadd.f32 %v1593_v11, %v1592_v8 }
 0xaea   :  { %v1609_v15 = vadd.f32 1e-05, %v1607_v0 }
 0xaeb   :  { %v1595_v13 = vrot.slane %v1594_v12, 2 }
 0xaec   :  { %4099 = vrsqrt.f32 %v1609_v15 }
 0xaed   :  { %v1596_v14 = vadd.f32 %v1595_v13, %v1594_v12 }
 0xaef   :  { %v1597_v16 = vrot.slane %v1596_v14, 1 }
 0xaf1   :  { %v1598_v17 = vadd.f32 %v1597_v16, %v1596_v14 }
 0xaf3   :  { %v1606_v18 = vmul.f32 0.125, %v1598_v17 }
 0xaf5   :  { %v1608_v19 = vadd.f32 1e-05, %v1606_v18 }
 0xaf7   :  { %4101 = vrsqrt.f32 %v1608_v19 }
 0xaf9   :  { %v4100_v20 = vpop.eup %4099 }
 0xafa   :  { %v1613_v21 = vmul.f32 %v4100_v20, %v1589_v54 }
 0xafc   :  { %v1615_v25 = vmul.f32 %v1613_v21, %v51_v22 }
 0xafe   :  { %v1617_v29 = vadd.f32 %v1615_v25, %v52_v26 }
 0xb04   :  { %v4102_v23 = vpop.eup %4101 }
 0xb05   :  { %v1612_v24 = vmul.f32 %v4102_v23, %v1588_v3 }
 0xb07   :  { %v1614_v27 = vmul.f32 %v1612_v24, %v51_v22 }
 0xb09   :  { %v1616_v28 = vadd.f32 %v1614_v27, %v52_v26 }
 0xb0b   :  { %3870 = vmatprep.mubr.msk.f32.mxu0 %vm80_vm0, %v1616_v28 }
 0xb0c   :  { %3871 = vmatmul.mubr.msk.f32.vlgmr.msra.gmra.mxu0 %vm80_vm0, %v1617_v29  ;;  %v3585_v29 = vld [vmem:[%s4851_s2 + $0x8] sm:$0xff]  ;;  %s4866_s2 = smov 8  }
 0xb0d   :  { %3909 = vmatpush3.msra.mxu0 %v3592_v42 }
 0xb0e   :  { %3910 = vmatprep.subr.mxu0 %v3591_v43 }
 0xb0f   :  { %3911 = vmatpush3.msra.mxu0 %v3591_v43 }
 0xb10   :  { %3912 = vmatprep.subr.mxu0 %v3590_v44 }
 0xb11   :  { %3913 = vmatpush3.msra.mxu0 %v3590_v44 }
 0xb12   :  { %3914 = vmatprep.subr.mxu0 %v3589_v40 }
 0xb13   :  { %3915 = vmatpush3.msra.mxu0 %v3589_v40 }
 0xb14   :  { %3919 = vmatprep.subr.mxu0 %v4165_v59 }
 0xbcc   :  { %v3872_v34 = vpop.f32.mrf.mxu0 }
 0xbcd   :  { %v1702_v35 = vadd.f32 %v3872_v34, %v3581_v33 }
 0xbce   :  { %v1696_v36 = vpop.f32.mrf.mxu0 }
 0xbcf   :  { %v1697_v37 = vadd.f32 %v3581_v33, %v1696_v36  ;;  %v1706_v41 = vmax.f32 %v1702_v35, 0.0  ;;  %v3616_v36 = vld [vmem:[%s4854_s5 + $0x1] ss:$0 sm:$0xff] }
 0xbd1   :  { %v1705_v39 = vmax.f32 %v1697_v37, 0.0 }
 0xbd3   :  { %3905 = vmatprep.mubr.f32.mxu1 %v1705_v39 }
 0xbd4   :  { %3906 = vmatmul.mubr.f32.vlgmr.msra.gmra.mxu1 %v1706_v41 }
 0xbd5   :  { %3946 = vmatprep.mubr.msk.f32.mxu1 %vm4166_vm1, %v4165_v59 }
 0xc94   :  { %v3907_v46 = vpop.f32.mrf.mxu1 }
 0xc95   :  { %v1785_v47 = vadd.f32 %v3907_v46, %v3584_v45 }
 0xc96   :  { %v1779_v48 = vpop.f32.mrf.mxu1 }
 0xc97   :  { %v4565_v49 = vadd.f32 %v1785_v47, %v4505_v2  ;;  %v1780_v50 = vadd.f32 %v3584_v45, %v1779_v48 }
 0xc99   :  { %v1838_v51 = vsel %vm80_vm0, %v4565_v49, 0.0  ;;  %v4570_v52 = vadd.f32 %v1780_v50, %v4514_v10 }
 0xc9a   :  { %v1839_v53 = vrot.slane %v1838_v51, 4 }
 0xc9b   :  { %v1831_v54 = vsel %vm80_vm0, %v4570_v52, 0.0 }
 0xc9c   :  { %v1840_v38 = vadd.f32 %v1839_v53, %v1838_v51  ;;  %v1832_v55 = vrot.slane %v1831_v54, 4 }
 0xc9e   :  { %v1841_v56 = vrot.slane %v1840_v38, 2  ;;  %v1833_v57 = vadd.f32 %v1832_v55, %v1831_v54 }
 0xca0   :  { %v1842_v58 = vadd.f32 %v1841_v56, %v1840_v38  ;;  %v1834_v63 = vrot.slane %v1833_v57, 2 }
 0xca2   :  { %v1843_v60 = vrot.slane %v1842_v58, 1  ;;  %v1835_v2 = vadd.f32 %v1834_v63, %v1833_v57 }
 0xca4   :  { %v1844_v61 = vadd.f32 %v1843_v60, %v1842_v58  ;;  %v1836_v9 = vrot.slane %v1835_v2, 1 }
 0xca6   :  { %v1846_v62 = vmul.f32 0.125, %v1844_v61  ;;  %v1837_v1 = vadd.f32 %v1836_v9, %v1835_v2 }
 0xca8   :  { %v1848_v3 = vsub.f32 %v4565_v49, %v1846_v62  ;;  %v1845_v10 = vmul.f32 0.125, %v1837_v1 }
 0xcaa   :  { %v1850_v5 = vmul.f32 %v1848_v3, %v1848_v3  ;;  %v1847_v6 = vsub.f32 %v4570_v52, %v1845_v10 }
 0xcac   :  { %v1858_v7 = vsel %vm80_vm0, %v1850_v5, 0.0  ;;  %v1849_v8 = vmul.f32 %v1847_v6, %v1847_v6 }
 0xcad   :  { %v1859_v11 = vrot.slane %v1858_v7, 4 }
 0xcae   :  { %v1851_v12 = vsel %vm80_vm0, %v1849_v8, 0.0 }
 0xcaf   :  { %v1860_v0 = vadd.f32 %v1859_v11, %v1858_v7  ;;  %v1852_v13 = vrot.slane %v1851_v12, 4 }
 0xcb1   :  { %v1861_v14 = vrot.slane %v1860_v0, 2  ;;  %v1853_v15 = vadd.f32 %v1852_v13, %v1851_v12 }
 0xcb3   :  { %v1862_v16 = vadd.f32 %v1861_v14, %v1860_v0  ;;  %v1854_v17 = vrot.slane %v1853_v15, 2 }
 0xcb5   :  { %v1863_v18 = vrot.slane %v1862_v16, 1  ;;  %v1855_v19 = vadd.f32 %v1854_v17, %v1853_v15 }
 0xcb7   :  { %v1864_v20 = vadd.f32 %v1863_v18, %v1862_v16  ;;  %v1856_v21 = vrot.slane %v1855_v19, 1 }
 0xcb9   :  { %v1866_v22 = vmul.f32 0.125, %v1864_v20  ;;  %v1857_v23 = vadd.f32 %v1856_v21, %v1855_v19 }
 0xcbb   :  { %v1868_v24 = vadd.f32 1e-05, %v1866_v22  ;;  %v1865_v25 = vmul.f32 0.125, %v1857_v23 }
 0xcbd   :  { %4103 = vrsqrt.f32 %v1868_v24  ;;  %v1867_v26 = vadd.f32 1e-05, %v1865_v25 }
 0xcbf   :  { %4105 = vrsqrt.f32 %v1867_v26 }
 0xcca   :  { %v4104_v27 = vpop.eup %4103 }
 0xccb   :  { %v1872_v28 = vmul.f32 %v4104_v27, %v1848_v3 }
 0xccc   :  { %v4106_v30 = vpop.eup %4105 }
 0xccd   :  { %v1871_v4 = vmul.f32 %v4106_v30, %v1847_v6  ;;  %v1874_v31 = vmul.f32 %v3585_v29, %v1872_v28 }
 0xccf   :  { %v1873_v33 = vmul.f32 %v3585_v29, %v1871_v4  ;;  %v1876_v35 = vadd.f32 %v3586_v32, %v1874_v31 }
 0xcd1   :  { %v1875_v34 = vadd.f32 %v3586_v32, %v1873_v33 }
 0xcd3   :  { %3916 = vmatprep.mubr.msk.f32.mxu0 %vm80_vm0, %v1875_v34 }
 0xcd4   :  { %3917 = vmatmul.mubr.msk.f32.vlgmr.msra.gmra.mxu0 %vm80_vm0, %v1876_v35 }
 0xcd5   :  { %3921 = vmatprep.mubr.msk.f32.mxu0 %vm4166_vm1, %v4165_v59 }
 0xd94   :  { %v3918_v37 = vpop.f32.mrf.mxu0 }
 0xd95   :  { %v4591_v39 = vadd.f32 %v3918_v37, %v3616_v36 }
 0xd96   :  { %v1955_v41 = vpop.f32.mrf.mxu0 }
 0xd97   :  { %v4593_v42 = vadd.f32 %v3616_v36, %v1955_v41  ;;  %2045 = vrot.lane.b32.xlu1 %v4591_v39, %s4167_s21  ;;  %v4610_v45 = vmul.f32 0.35355338, %v4591_v39 }
 0xd99   :  { %1967 = vrot.lane.b32.xlu0 %v4593_v42, %s4167_s21  ;;  %v4601_v44 = vmul.f32 0.35355338, %v4593_v42 }
 0xe09   :  { %v2046_v40 = vpop.permute.xlu1 %2045 }
 0xe0b   :  { %v1968_v43 = vpop.permute.xlu0 %1967 }
 0xe0c   :  { %3920 = vmatpush3.xpose.msk.msra.mxu0 %vm220_vm2, %v1968_v43 }
 0xe0d   :  { %3924 = vmatprep.subr.mxu0 %v4165_v59 }
 0xe0f   :  { %3922 = vmatmul.mubr.msk.f32.vlgmr.msra.gmra.mxu0 %vm220_vm2, %v4601_v44 }
 0xe10   :  { %3925 = vmatpush3.xpose.msk.msra.mxu0 %vm220_vm2, %v2046_v40  ;;  %3926 = vmatprep.mubr.msk.f32.mxu0 %vm4166_vm1, %v4165_v59 }
 0xe11   :  { %3929 = vmatprep.subr.mxu0 %v4165_v59 }
 0xe13   :  { %3927 = vmatmul.mubr.msk.f32.vlgmr.msra.gmra.mxu0 %vm220_vm2, %v4610_v45 }
 0xe14   :  { %3931 = vmatprep.mubr.msk.f32.mxu0 %vm4166_vm1, %v4165_v59 }
 0xecf   :  { %v2040_v46 = vpop.f32.mrf.mxu0 }
 0xed0   :  { %v2122_v47 = vsel %vm220_vm2, %v2040_v46, -inf }
 0xed1   :  { %2123 = vmax.xlane.f32.xlu0 %v2122_v47  ;;  %v3923_v48 = vpop.f32.mrf.mxu0 }
 0xed3   :  { %v2118_v50 = vpop.f32.mrf.mxu0 }
 0xed4   :  { %v2125_v51 = vsel %vm220_vm2, %v2118_v50, -inf }
 0xed5   :  { %2126 = vmax.xlane.f32.xlu1 %v2125_v51  ;;  %v3928_v53 = vpop.f32.mrf.mxu0 }
 0xee6   :  { %2144 = vrot.lane.b32.xlu1 %v4593_v42, %s4168_s22 }
 0xeea   :  { %2298 = vrot.lane.b32.xlu1 %v4593_v42, %s4169_s23 }
 0xeee   :  { %2376 = vrot.lane.b32.xlu1 %v4591_v39, %s4169_s23 }
 0xef2   :  { %2374 = vrot.lane.b32.xlu1 %v4610_v45, %s4170_s24 }
 0xf5a   :  { %v2124_v54 = vpop.xlane.xlu0 %2123 }
 0xf5b   :  { %v2128_v38 = vsub.f32 %v2040_v46, %v2124_v54 }
 0xf5d   :  { %v2130_v55 = vmul.f32 1.442695, %v2128_v38 }
 0xf5e   :  { %v2127_v56 = vpop.xlane.xlu1 %2126 }
 0xf5f   :  { %4107 = vpow2.f32 %v2130_v55  ;;  %v2129_v57 = vsub.f32 %v2118_v50, %v2127_v56 }
 0xf61   :  { %v2132_v58 = vmul.f32 1.442695, %v2129_v57 }
 0xf62   :  { %v2145_v63 = vpop.permute.xlu1 %2144 }
 0xf63   :  { %4109 = vpow2.f32 %v2132_v58  ;;  %3930 = vmatpush3.msra.mxu0 %v2145_v63 }
 0xf64   :  { %3934 = vmatprep.subr.mxu0 %v4165_v59 }
 0xf66   :  { %v2299_v60 = vpop.permute.xlu1 %2298 }
 0xf6a   :  { %v2377_v2 = vpop.permute.xlu1 %2376 }
 0xf6b   :  { %3945 = vmatpush3.xpose.msk.msra.mxu1 %vm220_vm2, %v2377_v2 }
 0xf6c   :  { %v4108_v61 = vpop.eup %4107  ;;  %3954 = vmatprep.subr.mxu1 %v4165_v59 }
 0xf6d   :  { %v2134_v9 = vsel %vm220_vm2, %v4108_v61, 0.0 }
 0xf6e   :  { %2135 = vadd.xlane.f32.xlu0 %v2134_v9  ;;  %v2375_v62 = vpop.permute.xlu1 %2374 }
 0xf6f   :  { %3947 = vmatmul.mubr.msk.f32.vlgmr.msra.gmra.mxu1 %vm220_vm2, %v2375_v62 }
 0xf70   :  { %v4110_v1 = vpop.eup %4109  ;;  %3956 = vmatprep.mubr.msk.f32.mxu1 %vm4166_vm1, %v4165_v59 }
 0xf71   :  { %v2137_v3 = vsel %vm220_vm2, %v4110_v1, 0.0 }
 0xf72   :  { %2138 = vadd.xlane.f32.xlu0 %v2137_v3 }
 0xf88   :  { %2220 = vrot.lane.b32.xlu0 %v4591_v39, %s4168_s22 }
 0xf8c   :  { %2296 = vrot.lane.b32.xlu0 %v4601_v44, %s4170_s24 }
 0xff7   :  { %v2136_v10 = vpop.xlane.xlu0 %2135 }
 0xff8   :  { %4111 = vrcp.f32 %v2136_v10 }
 0xffb   :  { %v2139_v5 = vpop.xlane.xlu0 %2138 }
 0xffc   :  { %4113 = vrcp.f32 %v2139_v5 }
 0xfff   :  { %v2221_v8 = vpop.permute.xlu0 %2220 }
0x1003   :  { %v2297_v0 = vpop.permute.xlu0 %2296 }
0x1005   :  { %v4112_v6 = vpop.eup %4111 }
0x1006   :  { %v2142_v7 = vmul.f32 %v4112_v6, %v4108_v61 }
0x1008   :  { %3932 = vmatmul.mubr.msk.f32.vlgmr.msra.gmra.mxu0 %vm220_vm2, %v2142_v7 }
0x1009   :  { %v4114_v11 = vpop.eup %4113  ;;  %3935 = vmatpush3.msra.mxu0 %v2221_v8  ;;  %3936 = vmatprep.mubr.msk.f32.mxu0 %vm4166_vm1, %v4165_v59 }
0x100a   :  { %3939 = vmatprep.subr.mxu0 %v4165_v59  ;;  %v2143_v12 = vmul.f32 %v4114_v11, %v4110_v1 }
0x100c   :  { %3937 = vmatmul.mubr.msk.f32.vlgmr.msra.gmra.mxu0 %vm220_vm2, %v2143_v12 }
0x100d   :  { %3940 = vmatpush3.xpose.msk.msra.mxu0 %vm220_vm2, %v2299_v60  ;;  %3941 = vmatprep.mubr.msk.f32.mxu0 %vm4166_vm1, %v4165_v59 }
0x100e   :  { %3949 = vmatprep.subr.mxu0 %v4165_v59 }
0x1010   :  { %3942 = vmatmul.mubr.msk.f32.vlgmr.msra.gmra.mxu0 %vm220_vm2, %v2297_v0 }
0x1011   :  { %3951 = vmatprep.mubr.msk.f32.mxu0 %vm4166_vm1, %v4165_v59 }
0x102f   :  { %v2448_v13 = vpop.f32.mrf.mxu1 }
0x1030   :  { %v2455_v14 = vsel %vm220_vm2, %v2448_v13, -inf }
0x1031   :  { %2456 = vmax.xlane.f32.xlu1 %v2455_v14  ;;  %v3948_v15 = vpop.f32.mrf.mxu1 }
0x1042   :  { %2474 = vrot.lane.b32.xlu1 %v4593_v42, %s4171_s25 }
0x1046   :  { %2628 = vrot.lane.b32.xlu1 %v4593_v42, %s4173_s27 }
0x104a   :  { %2706 = vrot.lane.b32.xlu1 %v4591_v39, %s4173_s27 }
0x104e   :  { %2704 = vrot.lane.b32.xlu1 %v4610_v45, %s4172_s26 }
0x10ba   :  { %v2457_v16 = vpop.xlane.xlu1 %2456 }
0x10bb   :  { %v2459_v17 = vsub.f32 %v2448_v13, %v2457_v16 }
0x10bd   :  { %v2462_v19 = vmul.f32 1.442695, %v2459_v17 }
0x10be   :  { %v2475_v18 = vpop.permute.xlu1 %2474 }
0x10bf   :  { %3950 = vmatpush3.msra.mxu0 %v2475_v18  ;;  %4115 = vpow2.f32 %v2462_v19 }
0x10c0   :  { %3959 = vmatprep.subr.mxu0 %v4165_v59 }
0x10c2   :  { %v2629_v34 = vpop.permute.xlu1 %2628 }
0x10c6   :  { %v2707_v37 = vpop.permute.xlu1 %2706 }
0x10c8   :  { %v4661_v20 = vpop.f32.mrf.mxu0 }
0x10ca   :  { %v3933_v21 = vpop.f32.mrf.mxu0  ;;  %v2705_v40 = vpop.permute.xlu1 %2704 }
0x10cc   :  { %v4663_v22 = vpop.f32.mrf.mxu0  ;;  %v4116_v26 = vpop.eup %4115 }
0x10cd   :  { %v2467_v28 = vsel %vm220_vm2, %v4116_v26, 0.0 }
0x10ce   :  { %v3938_v23 = vpop.f32.mrf.mxu0 }
0x10d0   :  { %v2370_v24 = vpop.f32.mrf.mxu0 }
0x10d1   :  { %v2452_v25 = vsel %vm220_vm2, %v2370_v24, -inf }
0x10d2   :  { %2453 = vmax.xlane.f32.xlu0 %v2452_v25  ;;  %v3943_v27 = vpop.f32.mrf.mxu0 }
0x10d6   :  { %2468 = vadd.xlane.f32.xlu0 %v2467_v28 }
0x115b   :  { %v2454_v29 = vpop.xlane.xlu0 %2453 }
0x115c   :  { %v2458_v30 = vsub.f32 %v2370_v24, %v2454_v29 }
0x115e   :  { %v2460_v4 = vmul.f32 1.442695, %v2458_v30 }
0x115f   :  { %v2469_v33 = vpop.xlane.xlu0 %2468 }
0x1160   :  { %4117 = vpow2.f32 %v2460_v4 }
0x1161   :  { %4119 = vrcp.f32 %v2469_v33 }
0x116d   :  { %v4118_v31 = vpop.eup %4117 }
0x116e   :  { %v2464_v32 = vsel %vm220_vm2, %v4118_v31, 0.0  ;;  %v4120_v36 = vpop.eup %4119 }
0x116f   :  { %2465 = vadd.xlane.f32.xlu0 %v2464_v32  ;;  %v2473_v43 = vmul.f32 %v4120_v36, %v4116_v26 }
0x1185   :  { %2550 = vrot.lane.b32.xlu0 %v4591_v39, %s4171_s25 }
0x1189   :  { %2626 = vrot.lane.b32.xlu0 %v4601_v44, %s4172_s26 }
0x11f8   :  { %v2466_v35 = vpop.xlane.xlu0 %2465 }
0x11f9   :  { %4121 = vrcp.f32 %v2466_v35 }
0x11fc   :  { %v2551_v41 = vpop.permute.xlu0 %2550 }
0x11fd   :  { %3955 = vmatpush3.msra.mxu1 %v2551_v41 }
0x11fe   :  { %3957 = vmatmul.mubr.msk.f32.vlgmr.msra.gmra.mxu1 %vm220_vm2, %v2473_v43  ;;  %3964 = vmatprep.subr.mxu1 %v4165_v59 }
0x11ff   :  { %3965 = vmatpush3.xpose.msk.msra.mxu1 %vm220_vm2, %v2707_v37  ;;  %3966 = vmatprep.mubr.msk.f32.mxu1 %vm4166_vm1, %v4165_v59 }
0x1200   :  { %3974 = vmatprep.subr.mxu1 %v4165_v59  ;;  %v2627_v48 = vpop.permute.xlu0 %2626 }
0x1202   :  { %3967 = vmatmul.mubr.msk.f32.vlgmr.msra.gmra.mxu1 %vm220_vm2, %v2705_v40 }
0x1203   :  { %3976 = vmatprep.mubr.msk.f32.mxu1 %vm4166_vm1, %v4165_v59 }
0x1206   :  { %v4122_v46 = vpop.eup %4121 }
0x1207   :  { %v2472_v47 = vmul.f32 %v4122_v46, %v4118_v31 }
0x1209   :  { %3952 = vmatmul.mubr.msk.f32.vlgmr.msra.gmra.mxu0 %vm220_vm2, %v2472_v47 }
0x120a   :  { %3960 = vmatpush3.xpose.msk.msra.mxu0 %vm220_vm2, %v2629_v34  ;;  %3961 = vmatprep.mubr.msk.f32.mxu0 %vm4166_vm1, %v4165_v59 }
0x120b   :  { %3969 = vmatprep.subr.mxu0 %v4165_v59 }
0x120d   :  { %3962 = vmatmul.mubr.msk.f32.vlgmr.msra.gmra.mxu0 %vm220_vm2, %v2627_v48 }
0x120e   :  { %3971 = vmatprep.mubr.msk.f32.mxu0 %vm4166_vm1, %v4165_v59 }
0x12be   :  { %v4689_v50 = vpop.f32.mrf.mxu1 }
0x12c0   :  { %v3958_v51 = vpop.f32.mrf.mxu1 }
0x12c2   :  { %v2778_v53 = vpop.f32.mrf.mxu1 }
0x12c3   :  { %v2785_v54 = vsel %vm220_vm2, %v2778_v53, -inf }
0x12c4   :  { %2786 = vmax.xlane.f32.xlu1 %v2785_v54  ;;  %v3968_v38 = vpop.f32.mrf.mxu1 }
0x12c5   :  { %v3597_v38 = vld [vmem:[%s4857_s8 + $0x38] sm:$0xff] }
0x12c9   :  { %v4692_v55 = vpop.f32.mrf.mxu0 }
0x12cb   :  { %v3953_v56 = vpop.f32.mrf.mxu0 }
0x12cc   :  { %v3595_v56 = vld [vmem:[%s4857_s8 + $0x28] sm:$0xff] }
0x12cd   :  { %v2700_v57 = vpop.f32.mrf.mxu0 }
0x12ce   :  { %v2782_v58 = vsel %vm220_vm2, %v2700_v57, -inf }
0x12cf   :  { %2783 = vmax.xlane.f32.xlu0 %v2782_v58  ;;  %v3963_v63 = vpop.f32.mrf.mxu0  ;;  %v3614_v58 = vld [vmem:[%s4859_s10 + $0xf8] sm:$0xff] }
0x12d0   :  { %v3613_v63 = vld [vmem:[%s4859_s10 + $0xf0] sm:$0xff] }
0x12d5   :  { %2804 = vrot.lane.b32.xlu1 %v4593_v42, %s4174_s28 }
0x12d9   :  { %2958 = vrot.lane.b32.xlu1 %v4593_v42, %s4175_s29 }
0x12dd   :  { %3036 = vrot.lane.b32.xlu1 %v4591_v39, %s4175_s29 }
0x12e1   :  { %3034 = vrot.lane.b32.xlu1 %v4610_v45, %s4176_s30 }
0x134d   :  { %v2787_v60 = vpop.xlane.xlu1 %2786 }
0x134e   :  { %v2789_v2 = vsub.f32 %v2778_v53, %v2787_v60  ;;  %v3612_v60 = vld [vmem:[%s4859_s10 + $0xe8] sm:$0xff] }
0x1350   :  { %v2792_v61 = vmul.f32 1.442695, %v2789_v2  ;;  %v3611_v2 = vld [vmem:[%s4859_s10 + $0xe0] sm:$0xff] }
0x1351   :  { %v2805_v9 = vpop.permute.xlu1 %2804 }
0x1352   :  { %4123 = vpow2.f32 %v2792_v61  ;;  %3970 = vmatpush3.msra.mxu0 %v2805_v9  ;;  %v3610_v61 = vld [vmem:[%s4859_s10 + $0xd8] sm:$0xff]  ;;  %v3609_v9 = vld [vmem:[%s4859_s10 + $0xd0] sm:$0xff] }
0x1353   :  { %3979 = vmatprep.subr.mxu0 %v4165_v59 }
0x1355   :  { %v2959_v8 = vpop.permute.xlu1 %2958 }
0x1358   :  { %v2784_v62 = vpop.xlane.xlu0 %2783 }
0x1359   :  { %v2788_v1 = vsub.f32 %v2700_v57, %v2784_v62  ;;  %v3037_v0 = vpop.permute.xlu1 %3036  ;;  %v3594_v57 = vld [vmem:[%s4857_s8 + $0x20] sm:$0xff]  ;;  %v3608_v62 = vld [vmem:[%s4859_s10 + $0xc8] sm:$0xff] }
0x135b   :  { %v2790_v3 = vmul.f32 1.442695, %v2788_v1  ;;  %v3607_v1 = vld [vmem:[%s4859_s10 + $0xc0] sm:$0xff] }
0x135d   :  { %4125 = vpow2.f32 %v2790_v3  ;;  %v3606_v3 = vld [vmem:[%s4859_s10 + $0xb8] sm:$0xff] }
0x135f   :  { %v4124_v10 = vpop.eup %4123 }
0x1360   :  { %v2797_v5 = vsel %vm220_vm2, %v4124_v10, 0.0 }
0x1361   :  { %2798 = vadd.xlane.f32.xlu0 %v2797_v5  ;;  %v3604_v5 = vld [vmem:[%s4859_s10 + $0xa8] sm:$0xff] }
0x136a   :  { %v4126_v6 = vpop.eup %4125 }
0x136b   :  { %v2794_v7 = vsel %vm220_vm2, %v4126_v6, 0.0 }
0x136c   :  { %2795 = vadd.xlane.f32.xlu0 %v2794_v7 }
0x1382   :  { %2880 = vrot.lane.b32.xlu0 %v4591_v39, %s4174_s28 }
0x1386   :  { %2956 = vrot.lane.b32.xlu0 %v4601_v44, %s4176_s30  ;;  %v3035_v44 = vpop.permute.xlu1 %3034 }
0x13ea   :  { %v2799_v45 = vpop.xlane.xlu0 %2798 }
0x13eb   :  { %4127 = vrcp.f32 %v2799_v45 }
0x13f5   :  { %v2796_v11 = vpop.xlane.xlu0 %2795 }
0x13f6   :  { %4129 = vrcp.f32 %v2796_v11 }
0x13f8   :  { %v4128_v12 = vpop.eup %4127 }
0x13f9   :  { %v2881_v13 = vpop.permute.xlu0 %2880  ;;  %v2803_v14 = vmul.f32 %v4128_v12, %v4124_v10  ;;  %v3605_v10 = vld [vmem:[%s4859_s10 + $0xb0] sm:$0xff] }
0x13fa   :  { %3975 = vmatpush3.msra.mxu1 %v2881_v13 }
0x13fb   :  { %3977 = vmatmul.mubr.msk.f32.vlgmr.msra.gmra.mxu1 %vm220_vm2, %v2803_v14  ;;  %3984 = vmatprep.subr.mxu1 %v4165_v59 }
0x13fc   :  { %3985 = vmatpush3.xpose.msk.msra.mxu1 %vm220_vm2, %v3037_v0  ;;  %3986 = vmatprep.mubr.msk.f32.mxu1 %vm4166_vm1, %v4165_v59 }
0x13fd   :  { %3994 = vmatprep.subr.mxu1 %v4165_v59  ;;  %v2957_v17 = vpop.permute.xlu0 %2956 }
0x13ff   :  { %3987 = vmatmul.mubr.msk.f32.vlgmr.msra.gmra.mxu1 %vm220_vm2, %v3035_v44 }
0x1400   :  { %3996 = vmatprep.mubr.msk.f32.mxu1 %vm4166_vm1, %v4165_v59 }
0x1403   :  { %v4130_v15 = vpop.eup %4129 }
0x1404   :  { %v2802_v16 = vmul.f32 %v4130_v15, %v4126_v6  ;;  %v3603_v6 = vld [vmem:[%s4859_s10 + $0xa0] sm:$0xff] }
0x1406   :  { %3972 = vmatmul.mubr.msk.f32.vlgmr.msra.gmra.mxu0 %vm220_vm2, %v2802_v16 }
0x1407   :  { %3980 = vmatpush3.xpose.msk.msra.mxu0 %vm220_vm2, %v2959_v8  ;;  %3981 = vmatprep.mubr.msk.f32.mxu0 %vm4166_vm1, %v4165_v59 }
0x1408   :  { %3989 = vmatprep.subr.mxu0 %v4165_v59 }
0x140a   :  { %3982 = vmatmul.mubr.msk.f32.vlgmr.msra.gmra.mxu0 %vm220_vm2, %v2957_v17 }
0x140b   :  { %3991 = vmatprep.mubr.msk.f32.mxu0 %vm4166_vm1, %v4165_v59 }
0x14bb   :  { %v2952_v18 = vpop.f32.mrf.mxu1 }
0x14bd   :  { %v3978_v19 = vpop.f32.mrf.mxu1 }
0x14bf   :  { %v3108_v21 = vpop.f32.mrf.mxu1 }
0x14c0   :  { %v3115_v23 = vsel %vm220_vm2, %v3108_v21, -inf }
0x14c1   :  { %3116 = vmax.xlane.f32.xlu1 %v3115_v23  ;;  %v3988_v24 = vpop.f32.mrf.mxu1 }
0x14c6   :  { %v2876_v25 = vpop.f32.mrf.mxu0 }
0x14c8   :  { %v3973_v26 = vpop.f32.mrf.mxu0 }
0x14ca   :  { %v3030_v27 = vpop.f32.mrf.mxu0 }
0x14cb   :  { %v3112_v28 = vsel %vm220_vm2, %v3030_v27, -inf }
0x14cc   :  { %3113 = vmax.xlane.f32.xlu0 %v3112_v28  ;;  %v3983_v29 = vpop.f32.mrf.mxu0 }
0x14d2   :  { %3134 = vrot.lane.b32.xlu1 %v4593_v42, %s4177_s13 }
0x14d6   :  { %3288 = vrot.lane.b32.xlu1 %v4692_v55, %s4866_s2  ;;  %v3596_v55 = vld [vmem:[%s4857_s8 + $0x30] sm:$0xff] }
0x14da   :  { %3290 = vrot.lane.b32.xlu1 %v4689_v50, %s4866_s2 }
0x14de   :  { %3298 = vrot.lane.b32.xlu1 %v2952_v18, %s4867_s3 }
0x154a   :  { %v3117_v59 = vpop.xlane.xlu1 %3116 }
0x154b   :  { %v3119_v30 = vsub.f32 %v3108_v21, %v3117_v59 }
0x154d   :  { %v3122_v4 = vmul.f32 1.442695, %v3119_v30 }
0x154e   :  { %v3135_v31 = vpop.permute.xlu1 %3134 }
0x154f   :  { %4131 = vpow2.f32 %v3122_v4  ;;  %3990 = vmatpush3.msra.mxu0 %v3135_v31 }
0x1550   :  { %3999 = vmatprep.subr.mxu0 %v3597_v38 }
0x1552   :  { %v3289_v7 = vpop.permute.xlu1 %3288 }
0x1553   :  { %v3310_v19 = vsel %vm220_vm2, %v4661_v20, %v3289_v7  ;;  %v3600_v7 = vld [vmem:[%s4859_s10 + $0x88] sm:$0xff] }
0x1555   :  { %v3114_v32 = vpop.xlane.xlu0 %3113 }
0x1556   :  { %v3118_v33 = vsub.f32 %v3030_v27, %v3114_v32  ;;  %v3291_v45 = vpop.permute.xlu1 %3290 }
0x1557   :  { %v3311_v11 = vsel %vm220_vm2, %v4663_v22, %v3291_v45  ;;  %v3599_v45 = vld [vmem:[%s4859_s10 + $0x80] sm:$0xff] }
0x1558   :  { %v3120_v34 = vmul.f32 1.442695, %v3118_v33 }
0x155a   :  { %4133 = vpow2.f32 %v3120_v34  ;;  %v3299_v8 = vpop.permute.xlu1 %3298 }
0x155b   :  { %v3313_v12 = vsel %vm1564_vm3, %v3311_v11, %v3299_v8  ;;  %v3643_v8 = vld [vmem:[%s4858_s9 + $0x1] ss:$0 sm:$0xff] }
0x155c   :  { %v4132_v35 = vpop.eup %4131 }
0x155d   :  { %v3127_v42 = vsel %vm220_vm2, %v4132_v35, 0.0 }
0x155e   :  { %3128 = vadd.xlane.f32.xlu0 %v3127_v42 }
0x1567   :  { %v4134_v36 = vpop.eup %4133 }
0x1568   :  { %v3124_v37 = vsel %vm220_vm2, %v4134_v36, 0.0 }
0x1569   :  { %3125 = vadd.xlane.f32.xlu0 %v3124_v37 }
0x157f   :  { %3210 = vrot.lane.b32.xlu0 %v4591_v39, %s4177_s13 }
0x1583   :  { %3296 = vrot.lane.b32.xlu0 %v2876_v25, %s4867_s3 }
0x15e7   :  { %v3129_v41 = vpop.xlane.xlu0 %3128 }
0x15e8   :  { %4135 = vrcp.f32 %v3129_v41 }
0x15f2   :  { %v3126_v43 = vpop.xlane.xlu0 %3125 }
0x15f3   :  { %4137 = vrcp.f32 %v3126_v43 }
0x15f5   :  { %v4136_v40 = vpop.eup %4135 }
0x15f6   :  { %v3211_v46 = vpop.permute.xlu0 %3210  ;;  %v3133_v47 = vmul.f32 %v4136_v40, %v4132_v35 }
0x15f7   :  { %3995 = vmatpush3.msra.mxu1 %v3211_v46 }
0x15f8   :  { %3997 = vmatmul.mubr.msk.f32.vlgmr.msra.gmra.mxu1 %vm220_vm2, %v3133_v47  ;;  %4010 = vmatprep.subr.mxu1 %v3614_v58 }
0x15f9   :  { %4011 = vmatpush3.msra.mxu1 %v3614_v58 }
0x15fa   :  { %4012 = vmatprep.subr.mxu1 %v3613_v63  ;;  %v3297_v16 = vpop.permute.xlu0 %3296 }
0x15fb   :  { %4013 = vmatpush3.msra.mxu1 %v3613_v63  ;;  %v3312_v22 = vsel %vm1564_vm3, %v3310_v19, %v3297_v16  ;;  %v3646_v16 = vld [vmem:[%s4860_s11 + $0x1] ss:$0 sm:$0xff] }
0x15fc   :  { %4014 = vmatprep.subr.mxu1 %v3612_v60 }
0x15fd   :  { %4015 = vmatpush3.msra.mxu1 %v3612_v60  ;;  %v3587_v60 = vld [vmem:[%s4855_s6 + $0x8] sm:$0xff] }
0x15fe   :  { %4016 = vmatprep.subr.mxu1 %v3611_v2 }
0x15ff   :  { %4017 = vmatpush3.msra.mxu1 %v3611_v2 }
0x1600   :  { %v4138_v48 = vpop.eup %4137  ;;  %4018 = vmatprep.subr.mxu1 %v3610_v61 }
0x1601   :  { %v3132_v50 = vmul.f32 %v4138_v48, %v4134_v36  ;;  %4019 = vmatpush3.msra.mxu1 %v3610_v61 }
0x1602   :  { %4020 = vmatprep.subr.mxu1 %v3609_v9 }
0x1603   :  { %3992 = vmatmul.mubr.msk.f32.vlgmr.msra.gmra.mxu0 %vm220_vm2, %v3132_v50  ;;  %4021 = vmatpush3.msra.mxu1 %v3609_v9 }
0x1604   :  { %4000 = vmatpush3.msra.mxu0 %v3597_v38  ;;  %4022 = vmatprep.subr.mxu1 %v3608_v62 }
0x1605   :  { %4001 = vmatprep.subr.mxu0 %v3596_v55  ;;  %4023 = vmatpush3.msra.mxu1 %v3608_v62  ;;  %v3588_v62 = vld [vmem:[%s4856_s7 + $0x8] sm:$0xff] }
0x1606   :  { %4002 = vmatpush3.msra.mxu0 %v3596_v55  ;;  %4024 = vmatprep.subr.mxu1 %v3607_v1 }
0x1607   :  { %4003 = vmatprep.subr.mxu0 %v3595_v56  ;;  %4025 = vmatpush3.msra.mxu1 %v3607_v1 }
0x1608   :  { %4004 = vmatpush3.msra.mxu0 %v3595_v56  ;;  %4026 = vmatprep.subr.mxu1 %v3606_v3 }
0x1609   :  { %4005 = vmatprep.subr.mxu0 %v3594_v57  ;;  %4027 = vmatpush3.msra.mxu1 %v3606_v3 }
0x160a   :  { %4006 = vmatpush3.msra.mxu0 %v3594_v57  ;;  %4028 = vmatprep.subr.mxu1 %v3605_v10 }
0x160b   :  { %4029 = vmatpush3.msra.mxu1 %v3605_v10 }
0x160c   :  { %4030 = vmatprep.subr.mxu1 %v3604_v5 }
0x160d   :  { %4031 = vmatpush3.msra.mxu1 %v3604_v5  ;;  %v3602_v5 = vld [vmem:[%s4859_s10 + $0x98] sm:$0xff] }
0x160e   :  { %4032 = vmatprep.subr.mxu1 %v3603_v6 }
0x160f   :  { %4033 = vmatpush3.msra.mxu1 %v3603_v6  ;;  %v3601_v6 = vld [vmem:[%s4859_s10 + $0x90] sm:$0xff]  ;;  %s4181_s10 = smov [#allocation2]  }
0x1610   :  { %4034 = vmatprep.subr.mxu1 %v3602_v5  ;;  %s3543_s19 = sshll.u32 %s4181_s10, 4  ;;  %s3544_s19 = int_to_ptr.vmem [resolvable:$true] %s3543_s19 }
0x1611   :  { %4035 = vmatpush3.msra.mxu1 %v3602_v5  ;;  %s4143_s9 = scalar_lea.vmem %s3544_s19, 256  ;;  %p4148_p1 = scmp.lt.s32.totalorder %s3544_s19, %s3544_s19 }
0x1612   :  { %4036 = vmatprep.subr.mxu1 %v3601_v6  ;;  %p4144_p0 = scmp.ne.s32.totalorder %s3544_s19, %s4143_s9  ;;  %p4149_p2 = scmp.lt.s32.totalorder %s4143_s9, %s4143_s9 }
0x1613   :  { %4037 = vmatpush3.msra.mxu1 %v3601_v6 }
0x1614   :  { %4038 = vmatprep.subr.mxu1 %v3600_v7  ;;  %p4150_p3 = por %p4149_p2, %p4148_p1 }
0x1615   :  { %4039 = vmatpush3.msra.mxu1 %v3600_v7 }
0x1616   :  { %4040 = vmatprep.subr.mxu1 %v3599_v45  ;;  %p4151_p4 = pnand %p4150_p3, %p4144_p0 }
0x1617   :  { %4041 = vmatpush3.msra.mxu1 %v3599_v45 }
0x16b8   :  { %v3282_v51 = vpop.f32.mrf.mxu1 }
0x16b9   :  { %3306 = vrot.lane.b32.xlu1 %v3282_v51, %s4180_s16 }
0x16ba   :  { %v3998_v39 = vpop.f32.mrf.mxu1 }
0x16c3   :  { %v3206_v53 = vpop.f32.mrf.mxu0 }
0x16c4   :  { %3304 = vrot.lane.b32.xlu0 %v3206_v53, %s4180_s16 }
0x16c5   :  { %v3993_v54 = vpop.f32.mrf.mxu0 }
0x172b   :  { %v3307_v0 = vpop.permute.xlu1 %3306 }
0x172c   :  { %v3315_v13 = vsel %vm1567_vm4, %v3313_v12, %v3307_v0 }
0x172d   :  { %v4798_v14 = vadd.f32 %v3315_v13, %v4565_v49 }
0x172f   :  { %v3325_v44 = vsel %vm80_vm0, %v4798_v14, 0.0 }
0x1730   :  { %v3326_v15 = vrot.slane %v3325_v44, 4 }
0x1732   :  { %v3327_v17 = vadd.f32 %v3326_v15, %v3325_v44 }
0x1734   :  { %v3328_v18 = vrot.slane %v3327_v17, 2 }
0x1736   :  { %v3329_v21 = vadd.f32 %v3328_v18, %v3327_v17  ;;  %v3305_v23 = vpop.permute.xlu0 %3304 }
0x1737   :  { %v3314_v24 = vsel %vm1567_vm4, %v3312_v22, %v3305_v23 }
0x1738   :  { %v3330_v25 = vrot.slane %v3329_v21, 1  ;;  %v4807_v49 = vadd.f32 %v3314_v24, %v4570_v52 }
0x173a   :  { %v3331_v26 = vadd.f32 %v3330_v25, %v3329_v21  ;;  %v3318_v27 = vsel %vm80_vm0, %v4807_v49, 0.0 }
0x173b   :  { %v3319_v28 = vrot.slane %v3318_v27, 4 }
0x173c   :  { %v3333_v29 = vmul.f32 0.125, %v3331_v26 }
0x173d   :  { %v3320_v59 = vadd.f32 %v3319_v28, %v3318_v27 }
0x173e   :  { %v3335_v30 = vsub.f32 %v4798_v14, %v3333_v29 }
0x173f   :  { %v3321_v20 = vrot.slane %v3320_v59, 2 }
0x1740   :  { %v3337_v4 = vmul.f32 %v3335_v30, %v3335_v30 }
0x1741   :  { %v3322_v31 = vadd.f32 %v3321_v20, %v3320_v59 }
0x1742   :  { %v3345_v32 = vsel %vm80_vm0, %v3337_v4, 0.0 }
0x1743   :  { %v3346_v33 = vrot.slane %v3345_v32, 4  ;;  %v3323_v34 = vrot.slane %v3322_v31, 1 }
0x1745   :  { %v3347_v35 = vadd.f32 %v3346_v33, %v3345_v32  ;;  %v3324_v42 = vadd.f32 %v3323_v34, %v3322_v31 }
0x1747   :  { %v3348_v52 = vrot.slane %v3347_v35, 2  ;;  %v3332_v36 = vmul.f32 0.125, %v3324_v42 }
0x1749   :  { %v3349_v37 = vadd.f32 %v3348_v52, %v3347_v35  ;;  %v3334_v41 = vsub.f32 %v4807_v49, %v3332_v36 }
0x174b   :  { %v3350_v43 = vrot.slane %v3349_v37, 1  ;;  %v3336_v40 = vmul.f32 %v3334_v41, %v3334_v41 }
0x174d   :  { %v3351_v46 = vadd.f32 %v3350_v43, %v3349_v37  ;;  %v3338_v47 = vsel %vm80_vm0, %v3336_v40, 0.0 }
0x174e   :  { %v3339_v48 = vrot.slane %v3338_v47, 4 }
0x174f   :  { %v3353_v51 = vmul.f32 0.125, %v3351_v46 }
0x1750   :  { %v3340_v50 = vadd.f32 %v3339_v48, %v3338_v47 }
0x1751   :  { %v3355_v54 = vadd.f32 1e-05, %v3353_v51 }
0x1752   :  { %v3341_v39 = vrot.slane %v3340_v50, 2 }
0x1753   :  { %4139 = vrsqrt.f32 %v3355_v54 }
0x1754   :  { %v3342_v53 = vadd.f32 %v3341_v39, %v3340_v50 }
0x1756   :  { %v3343_v38 = vrot.slane %v3342_v53, 1 }
0x1758   :  { %v3344_v55 = vadd.f32 %v3343_v38, %v3342_v53 }
0x175a   :  { %v3352_v56 = vmul.f32 0.125, %v3344_v55 }
0x175c   :  { %v3354_v57 = vadd.f32 1e-05, %v3352_v56 }
0x175e   :  { %4141 = vrsqrt.f32 %v3354_v57 }
0x1760   :  { %v4140_v58 = vpop.eup %4139 }
0x1761   :  { %v3359_v63 = vmul.f32 %v4140_v58, %v3335_v30 }
0x1763   :  { %v3361_v9 = vmul.f32 %v3587_v60, %v3359_v63 }
0x1765   :  { %v3363_v10 = vadd.f32 %v3588_v62, %v3361_v9 }
0x176b   :  { %v4142_v2 = vpop.eup %4141 }
0x176c   :  { %v3358_v61 = vmul.f32 %v4142_v2, %v3334_v41 }
0x176e   :  { %v3360_v1 = vmul.f32 %v3587_v60, %v3358_v61 }
0x1770   :  { %v3362_v3 = vadd.f32 %v3588_v62, %v3360_v1 }
0x1772   :  { %4007 = vmatprep.mubr.msk.f32.mxu0 %vm80_vm0, %v3362_v3 }
0x1773   :  { %4008 = vmatmul.mubr.msk.f32.vlgmr.msra.gmra.mxu0 %vm80_vm0, %v3363_v10 }
0x1833   :  { %v4009_v11 = vpop.f32.mrf.mxu0 }
0x1834   :  { %v3448_v12 = vadd.f32 %v4009_v11, %v3643_v8 }
0x1835   :  { %v3442_v0 = vpop.f32.mrf.mxu0 }
0x1836   :  { %v3443_v13 = vadd.f32 %v3643_v8, %v3442_v0  ;;  %v3452_v15 = vmax.f32 %v3448_v12, 0.0 }
0x1838   :  { %v3451_v44 = vmax.f32 %v3443_v13, 0.0 }
0x183a   :  { %4042 = vmatprep.mubr.f32.mxu1 %v3451_v44 }
0x183b   :  { %4043 = vmatmul.mubr.f32.vlgmr.msra.gmra.mxu1 %v3452_v15 }
0x18fb   :  { %v4044_v17 = vpop.f32.mrf.mxu1 }
0x18fc   :  { %v3531_v18 = vadd.f32 %v4044_v17, %v3646_v16 }
0x18fd   :  { %v3525_v19 = vpop.f32.mrf.mxu1 }
0x18fe   :  { %v3535_v22 = vadd.f32 %v3531_v18, %v4798_v14  ;;  %v3526_v21 = vadd.f32 %v3646_v16, %v3525_v19 }
0x1900   :  { %3537 = vst.msk [vmem:[#allocation2 + $0x8] sm:$0xff] %vm80_vm0, %v3535_v22  ;;  %v3534_v23 = vadd.f32 %v3526_v21, %v4807_v49 }
0x1902   :  { %3536 = vst.msk [vmem:[#allocation2] sm:$0xff] %vm80_vm0, %v3534_v23 }
0x1903   :  { %4154 = shalt.err (!%p4151_p4)
}
0x1904   :  { %s4182_s11 = smov 128  }
0x1905   :  { %3549 = dma.vmem_to_hbm [thread:$0]  %s3544_s19, 256, %s4861_s12, [#allocation3], %s4182_s11, %s4182_s11, %s4866_s2  }
0x1906   :  { %4163 = dma.done.wait [#allocation3], 256  }
0x1907   :  { %4164 = vsyncadd [#allocation3], 4294967040 }
0x1908   :  { %3553 = vsyncpa [#allocation3], 1 }

</bundles_post_ra>
